<compile_context>
chip_gen: v5e
topology: v5e:2x2
jax: 0.10.0
libtpu: 0.0.40
codegen_flags: <defaults>
</compile_context>

<pallas_src>
import functools

import jax
import jax.numpy as jnp
from jax import lax
from jax.experimental import pallas as pl
from jax.experimental.pallas import tpu as pltpu

EPS = 1e-5


def _compiler_params():
    # Generation-conditional VMEM budget: ~3/4 of physical VMEM.
    try:
        cap = int(pltpu.get_tpu_info().vmem_capacity_bytes)
    except Exception:
        cap = 64 * 1024 * 1024
    return pltpu.CompilerParams(
        dimension_semantics=("parallel",),           # megacore sharding on v7x
        vmem_limit_bytes=min(cap * 3 // 4, 112 * 1024 * 1024))


# ----------------------------- Pallas kernels ------------------------------

def conv3x3_stats_kernel(xp_ref, w_ref, mask_ref, y_ref, stats_ref, *, wp):
    """3x3 conv for one image, channel-major, lane-dense output.

    xp_ref:    (Cin, PADF)   f32  flat zero-padded image (+2 tail zeros)
    w_ref:     (9, Cout, Cin) bf16  per-(ky,kx) weight slabs
    mask_ref:  (1, H*Wp)     f32  1 on valid columns, 0 on the 2 junk columns
    y_ref:     (Cout, H*Wp)  bf16  raw conv output (junk columns zeroed)
    stats_ref: (Cout, 2)     f32  per-image [sum, sum of squares] (exact f32)
    """
    hwp = y_ref.shape[-1]
    mask = mask_ref[...]
    acc = jnp.zeros(y_ref.shape, jnp.float32)
    for ky in range(3):
        for kx in range(3):
            off = ky * wp + kx                        # contiguous lane window
            tap = xp_ref[:, off:off + hwp].astype(jnp.bfloat16)
            acc = acc + jnp.dot(w_ref[ky * 3 + kx], tap,
                                preferred_element_type=jnp.float32)
    acc = acc * mask                                  # zero junk columns
    y_ref[...] = acc.astype(y_ref.dtype)
    stats_ref[:, 0:1] = jnp.sum(acc, axis=1, keepdims=True)
    stats_ref[:, 1:2] = jnp.sum(acc * acc, axis=1, keepdims=True)


def bn_relu_conv3x3_stats_kernel(y1_ref, scale_ref, shift_ref, w_ref, mask_ref,
                                 y2_ref, stats_ref, xbuf_ref, *, wp):
    """Fused BN1 + ReLU -> 3x3 conv2 (+ stats) for one image.

    y1_ref:   (C, H*Wp)   bf16  conv1 output (junk cols zero)
    scale/shift: (C, 1)   f32   folded global BN1 scale/shift
    w_ref:    (9, C, C)   bf16
    y2_ref:   (C, H*Wp)   bf16
    stats_ref:(C, 2)      f32
    xbuf_ref: (C, PADF)   f32   VMEM scratch = zero-padded BN1(ReLU) image
    """
    hwp = y2_ref.shape[-1]
    mask = mask_ref[...]
    # BN1 + ReLU in f32; re-zero junk columns so the padded rebuild is exact.
    out1 = jnp.maximum(y1_ref[...].astype(jnp.float32) * scale_ref[...]
                       + shift_ref[...], 0.0) * mask
    # Rebuild the zero-padded (padding=1) image entirely in VMEM: because the
    # junk columns of out1 are zero, shifting the flat image by Wp+1 inside a
    # zeroed (C, PADF) buffer reproduces the (Hp, Wp) padded layout exactly.
    xbuf_ref[...] = jnp.zeros(xbuf_ref.shape, xbuf_ref.dtype)
    xbuf_ref[:, wp + 1:wp + 1 + hwp] = out1
    acc = jnp.zeros(y2_ref.shape, jnp.float32)
    for ky in range(3):
        for kx in range(3):
            off = ky * wp + kx
            tap = xbuf_ref[:, off:off + hwp].astype(jnp.bfloat16)
            acc = acc + jnp.dot(w_ref[ky * 3 + kx], tap,
                                preferred_element_type=jnp.float32)
    acc = acc * mask
    y2_ref[...] = acc.astype(y2_ref.dtype)
    stats_ref[:, 0:1] = jnp.sum(acc, axis=1, keepdims=True)
    stats_ref[:, 1:2] = jnp.sum(acc * acc, axis=1, keepdims=True)


def bn_add_relu_kernel(y_ref, scale_ref, shift_ref, res_ref, o_ref):
    """BN2 + residual add + ReLU (all lane-dense, f32 math)."""
    a = (y_ref[...].astype(jnp.float32) * scale_ref[...] + shift_ref[...]
         + res_ref[...])
    o_ref[...] = jnp.maximum(a, 0.0).astype(o_ref.dtype)


# ------------------------------- wrappers -----------------------------------

def _bn_scale_shift(stats, gamma, beta, count):
    """Per-image [sum, sumsq] -> exact global per-channel scale/shift (f32)."""
    tot = jnp.sum(stats.astype(jnp.float32), axis=0)          # (C, 2)
    mean = tot[:, 0] / count
    var = jnp.maximum(tot[:, 1] / count - mean * mean, 0.0)   # biased variance
    scale = gamma.reshape(-1).astype(jnp.float32) * lax.rsqrt(var + EPS)
    shift = beta.reshape(-1).astype(jnp.float32) - mean * scale
    return scale.reshape(-1, 1), shift.reshape(-1, 1)         # (C, 1) each


def residual_block_forward(x_nchw, params):
    """params = (w1, g1, b1, w2, g2, b2); w*: (3,3,Cin,Cout) HWIO, g/b: (1,C)."""
    w1, g1, b1, w2, g2, b2 = params
    x = x_nchw.astype(jnp.float32)                  # already channel-major NCHW
    n, cin, h, w = x.shape
    cout = w1.shape[-1]
    assert cin == cout, "downsample=None requires in_channels == out_channels"

    hp, wp = h + 2, w + 2
    hwp = h * wp                                    # lane width of activations
    padf = hp * wp + 2                              # flat padded image + tail 0s

    # Single zero-padded, flattened, channel-major copy of the input (no tap
    # duplication).  f32 so the unaligned lane-offset tap loads are 32-bit.
    xpad = jnp.pad(x, ((0, 0), (0, 0), (1, 1), (1, 1)))        # (N,C,Hp,Wp)
    xflat = jnp.pad(xpad.reshape(n, cin, hp * wp),
                    ((0, 0), (0, 0), (0, padf - hp * wp)))     # (N,C,PADF) f32

    # Residual in the same lane-dense (C, H*Wp) layout; its junk columns are
    # automatically zero because they fall on the padding of xflat.
    residual = xflat[:, :, wp + 1: wp + 1 + hwp]               # (N,C,HWP) f32

    # Lane mask: 1 on the W valid columns of each Wp-wide row, 0 on the junk.
    mask = (jnp.arange(hwp) % wp < w).astype(jnp.float32).reshape(1, hwp)

    # Weights (3,3,Cin,Cout) HWIO -> (9, Cout, Cin) bf16 MXU operands.
    w1r = jnp.transpose(w1, (0, 1, 3, 2)).reshape(9, cout, cin).astype(jnp.bfloat16)
    w2r = jnp.transpose(w2, (0, 1, 3, 2)).reshape(9, cout, cout).astype(jnp.bfloat16)

    cparams = _compiler_params()
    row = lambda i: (i, 0, 0)
    bcast2 = lambda i: (0, 0)
    bcast3 = lambda i: (0, 0, 0)

    # --- conv1 (per-image grid) + f32 partial stats ---
    y1, st1 = pl.pallas_call(
        functools.partial(conv3x3_stats_kernel, wp=wp),
        out_shape=(jax.ShapeDtypeStruct((n, cout, hwp), jnp.bfloat16),
                   jax.ShapeDtypeStruct((n, cout, 2), jnp.float32)),
        grid=(n,),
        in_specs=[pl.BlockSpec((None, cin, padf), row),
                  pl.BlockSpec((9, cout, cin), bcast3),
                  pl.BlockSpec((1, hwp), bcast2)],
        out_specs=(pl.BlockSpec((None, cout, hwp), row),
                   pl.BlockSpec((None, cout, 2), row)),
        compiler_params=cparams,
    )(xflat, w1r, mask)
    sc1, sh1 = _bn_scale_shift(st1, g1, b1, n * h * w)

    # --- fused BN1 + ReLU -> conv2 + f32 partial stats ---
    y2, st2 = pl.pallas_call(
        functools.partial(bn_relu_conv3x3_stats_kernel, wp=wp),
        out_shape=(jax.ShapeDtypeStruct((n, cout, hwp), jnp.bfloat16),
                   jax.ShapeDtypeStruct((n, cout, 2), jnp.float32)),
        grid=(n,),
        in_specs=[pl.BlockSpec((None, cout, hwp), row),
                  pl.BlockSpec((cout, 1), bcast2),
                  pl.BlockSpec((cout, 1), bcast2),
                  pl.BlockSpec((9, cout, cout), bcast3),
                  pl.BlockSpec((1, hwp), bcast2)],
        out_specs=(pl.BlockSpec((None, cout, hwp), row),
                   pl.BlockSpec((None, cout, 2), row)),
        scratch_shapes=[pltpu.VMEM((cout, padf), jnp.float32)],
        compiler_params=cparams,
    )(y1, sc1, sh1, w2r, mask)
    sc2, sh2 = _bn_scale_shift(st2, g2, b2, n * h * w)

    # --- BN2 + residual add + ReLU ---
    out = pl.pallas_call(
        bn_add_relu_kernel,
        out_shape=jax.ShapeDtypeStruct((n, cout, hwp), jnp.float32),
        grid=(n,),
        in_specs=[pl.BlockSpec((None, cout, hwp), row),
                  pl.BlockSpec((cout, 1), bcast2),
                  pl.BlockSpec((cout, 1), bcast2),
                  pl.BlockSpec((None, cout, hwp), row)],
        out_specs=pl.BlockSpec((None, cout, hwp), row),
        compiler_params=cparams,
    )(y2, sc2, sh2, residual)

    # Drop the 2 junk columns per row; layout is already NCHW.
    return out.reshape(n, cout, h, wp)[:, :, :, :w]


# ------------------------ pure-JAX reference (check) -------------------------

def reference_forward(x_nchw, params):
    """Same module math with the kernel's precision policy: bf16 matmul
    operands, f32 accumulation, exact f32 batch statistics, and bf16 storage
    of the intermediate conv outputs before the BN apply."""
    w1, g1, b1, w2, g2, b2 = params

    def conv(x, w_hwio):
        w_oihw = jnp.transpose(w_hwio, (3, 2, 0, 1)).astype(jnp.bfloat16)
        return lax.conv_general_dilated(
            x.astype(jnp.bfloat16), w_oihw, window_strides=(1, 1),
            padding=((1, 1), (1, 1)),
            dimension_numbers=("NCHW", "OIHW", "NCHW"),
            preferred_element_type=jnp.float32)

    def bn(y_f32, g, b):
        mean = jnp.mean(y_f32, axis=(0, 2, 3), keepdims=True)
        var = jnp.mean((y_f32 - mean) ** 2, axis=(0, 2, 3), keepdims=True)
        scale = g.reshape(1, -1, 1, 1) * lax.rsqrt(var + EPS)
        shift = b.reshape(1, -1, 1, 1) - mean * scale
        yq = y_f32.astype(jnp.bfloat16).astype(jnp.float32)   # bf16 storage
        return yq * scale + shift

    out = jnp.maximum(bn(conv(x_nchw, w1), g1, b1), 0.0)
    out = bn(conv(out, w2), g2, b2) + x_nchw
    return jnp.maximum(out, 0.0)


# ---------------------------------- main -------------------------------------

if __name__ == "__main__":
    key = jax.random.PRNGKey(0)
    k = jax.random.split(key, 7)

    N, C, H, W = 2, 4, 16, 16      # in_channels == out_channels, stride=1
    x = jax.random.normal(k[0], (N, C, H, W), jnp.float32)

    # Deterministic synthetic parameters (shapes from ResidualBlock.__init__):
    #   conv weights: (3,3,Cin,Cout) HWIO (PyTorch OIHW transposed), no bias.
    #   BN affine params: gamma/beta per channel, stored as (1, C).
    w1 = jax.random.normal(k[1], (3, 3, C, C), jnp.float32) * 0.1
    w2 = jax.random.normal(k[2], (3, 3, C, C), jnp.float32) * 0.1
    g1 = 1.0 + 0.1 * jax.random.normal(k[3], (1, C), jnp.float32)
    b1 = 0.1 * jax.random.normal(k[4], (1, C), jnp.float32)
    g2 = 1.0 + 0.1 * jax.random.normal(k[5], (1, C), jnp.float32)
    b2 = 0.1 * jax.random.normal(k[6], (1, C), jnp.float32)
    params = (w1, g1, b1, w2, g2, b2)

    fwd = jax.jit(residual_block_forward)
    out = jax.block_until_ready(fwd(x, params))

    ref = reference_forward(x, params)
    assert out.shape == ref.shape == (N, C, H, W)
    assert bool(jnp.all(jnp.isfinite(out)))
    assert bool(jnp.allclose(out, ref, atol=2e-2, rtol=2e-2)), (
        "Pallas output mismatch vs JAX reference")

    print("KERNEL_OK")
</pallas_src>

<mosaic_0001>
module attributes {stable_mosaic.version = 11 : i64} {
  func.func @conv3x3_stats_kernel(%arg0: i32, %arg1: memref<1x4x326xf32, #tpu.memory_space<vmem>>, %arg2: memref<9x4x4xbf16, #tpu.memory_space<vmem>>, %arg3: memref<1x288xf32, #tpu.memory_space<vmem>>, %arg4: memref<1x4x288xbf16, #tpu.memory_space<vmem>>, %arg5: memref<1x4x2xf32, #tpu.memory_space<vmem>>) attributes {dimension_semantics = [#tpu.dimension_semantics<parallel>], iteration_bounds = array<i64: 2>, scalar_prefetch = 0 : i64, scratch_operands = 0 : i64, tpu.core_type = #tpu.core_type<tc>, window_params = [{transform_indices = @transform_0, window_bounds = array<i64: 1, 4, 326>}, {pipeline_mode = #tpu.pipeline_mode<synchronous>, transform_indices = @transform_1, window_bounds = array<i64: 9, 4, 4>}, {pipeline_mode = #tpu.pipeline_mode<synchronous>, transform_indices = @transform_2, window_bounds = array<i64: 1, 288>}, {transform_indices = @transform_3, window_bounds = array<i64: 1, 4, 288>}, {transform_indices = @transform_4, window_bounds = array<i64: 1, 4, 2>}]} {
    %c0 = arith.constant 0 : index
    %c0_0 = arith.constant 0 : index
    %0 = vector.load %arg3[%c0, %c0_0] : memref<1x288xf32, #tpu.memory_space<vmem>>, vector<1x288xf32>
    %cst = arith.constant 0.000000e+00 : f32
    %1 = vector.broadcast %cst : f32 to vector<4x288xf32>
    %c0_1 = arith.constant 0 : index
    %c0_2 = arith.constant 0 : index
    %c0_3 = arith.constant 0 : index
    %2 = vector.load %arg1[%c0_1, %c0_2, %c0_3] : memref<1x4x326xf32, #tpu.memory_space<vmem>>, vector<1x4x288xf32>
    %3 = vector.shape_cast %2 : vector<1x4x288xf32> to vector<4x288xf32>
    %4 = arith.truncf %3 : vector<4x288xf32> to vector<4x288xbf16>
    %c0_4 = arith.constant 0 : index
    %c0_5 = arith.constant 0 : index
    %c0_6 = arith.constant 0 : index
    %5 = vector.load %arg2[%c0_4, %c0_5, %c0_6] : memref<9x4x4xbf16, #tpu.memory_space<vmem>>, vector<1x4x4xbf16>
    %6 = vector.shape_cast %5 : vector<1x4x4xbf16> to vector<4x4xbf16>
    %cst_7 = arith.constant dense<0.000000e+00> : vector<4x288xf32>
    %7 = tpu.matmul %6, %4, %cst_7 {dimension_numbers = #tpu.dot_dimension_numbers<[1], [0], [0], [1], [0, 0, 1, 1], [], []>} : vector<4x4xbf16>, vector<4x288xbf16>, vector<4x288xf32> -> vector<4x288xf32>
    %8 = arith.addf %1, %7 : vector<4x288xf32>
    %c0_8 = arith.constant 0 : index
    %c0_9 = arith.constant 0 : index
    %c1 = arith.constant 1 : index
    %9 = vector.load %arg1[%c0_8, %c0_9, %c1] : memref<1x4x326xf32, #tpu.memory_space<vmem>>, vector<1x4x288xf32>
    %10 = vector.shape_cast %9 : vector<1x4x288xf32> to vector<4x288xf32>
    %11 = arith.truncf %10 : vector<4x288xf32> to vector<4x288xbf16>
    %c1_10 = arith.constant 1 : index
    %c0_11 = arith.constant 0 : index
    %c0_12 = arith.constant 0 : index
    %12 = vector.load %arg2[%c1_10, %c0_11, %c0_12] : memref<9x4x4xbf16, #tpu.memory_space<vmem>>, vector<1x4x4xbf16>
    %13 = vector.shape_cast %12 : vector<1x4x4xbf16> to vector<4x4xbf16>
    %cst_13 = arith.constant dense<0.000000e+00> : vector<4x288xf32>
    %14 = tpu.matmul %13, %11, %cst_13 {dimension_numbers = #tpu.dot_dimension_numbers<[1], [0], [0], [1], [0, 0, 1, 1], [], []>} : vector<4x4xbf16>, vector<4x288xbf16>, vector<4x288xf32> -> vector<4x288xf32>
    %15 = arith.addf %8, %14 : vector<4x288xf32>
    %c0_14 = arith.constant 0 : index
    %c0_15 = arith.constant 0 : index
    %c2 = arith.constant 2 : index
    %16 = vector.load %arg1[%c0_14, %c0_15, %c2] : memref<1x4x326xf32, #tpu.memory_space<vmem>>, vector<1x4x288xf32>
    %17 = vector.shape_cast %16 : vector<1x4x288xf32> to vector<4x288xf32>
    %18 = arith.truncf %17 : vector<4x288xf32> to vector<4x288xbf16>
    %c2_16 = arith.constant 2 : index
    %c0_17 = arith.constant 0 : index
    %c0_18 = arith.constant 0 : index
    %19 = vector.load %arg2[%c2_16, %c0_17, %c0_18] : memref<9x4x4xbf16, #tpu.memory_space<vmem>>, vector<1x4x4xbf16>
    %20 = vector.shape_cast %19 : vector<1x4x4xbf16> to vector<4x4xbf16>
    %cst_19 = arith.constant dense<0.000000e+00> : vector<4x288xf32>
    %21 = tpu.matmul %20, %18, %cst_19 {dimension_numbers = #tpu.dot_dimension_numbers<[1], [0], [0], [1], [0, 0, 1, 1], [], []>} : vector<4x4xbf16>, vector<4x288xbf16>, vector<4x288xf32> -> vector<4x288xf32>
    %22 = arith.addf %15, %21 : vector<4x288xf32>
    %c0_20 = arith.constant 0 : index
    %c0_21 = arith.constant 0 : index
    %c18 = arith.constant 18 : index
    %23 = vector.load %arg1[%c0_20, %c0_21, %c18] : memref<1x4x326xf32, #tpu.memory_space<vmem>>, vector<1x4x288xf32>
    %24 = vector.shape_cast %23 : vector<1x4x288xf32> to vector<4x288xf32>
    %25 = arith.truncf %24 : vector<4x288xf32> to vector<4x288xbf16>
    %c3 = arith.constant 3 : index
    %c0_22 = arith.constant 0 : index
    %c0_23 = arith.constant 0 : index
    %26 = vector.load %arg2[%c3, %c0_22, %c0_23] : memref<9x4x4xbf16, #tpu.memory_space<vmem>>, vector<1x4x4xbf16>
    %27 = vector.shape_cast %26 : vector<1x4x4xbf16> to vector<4x4xbf16>
    %cst_24 = arith.constant dense<0.000000e+00> : vector<4x288xf32>
    %28 = tpu.matmul %27, %25, %cst_24 {dimension_numbers = #tpu.dot_dimension_numbers<[1], [0], [0], [1], [0, 0, 1, 1], [], []>} : vector<4x4xbf16>, vector<4x288xbf16>, vector<4x288xf32> -> vector<4x288xf32>
    %29 = arith.addf %22, %28 : vector<4x288xf32>
    %c0_25 = arith.constant 0 : index
    %c0_26 = arith.constant 0 : index
    %c19 = arith.constant 19 : index
    %30 = vector.load %arg1[%c0_25, %c0_26, %c19] : memref<1x4x326xf32, #tpu.memory_space<vmem>>, vector<1x4x288xf32>
    %31 = vector.shape_cast %30 : vector<1x4x288xf32> to vector<4x288xf32>
    %32 = arith.truncf %31 : vector<4x288xf32> to vector<4x288xbf16>
    %c4 = arith.constant 4 : index
    %c0_27 = arith.constant 0 : index
    %c0_28 = arith.constant 0 : index
    %33 = vector.load %arg2[%c4, %c0_27, %c0_28] : memref<9x4x4xbf16, #tpu.memory_space<vmem>>, vector<1x4x4xbf16>
    %34 = vector.shape_cast %33 : vector<1x4x4xbf16> to vector<4x4xbf16>
    %cst_29 = arith.constant dense<0.000000e+00> : vector<4x288xf32>
    %35 = tpu.matmul %34, %32, %cst_29 {dimension_numbers = #tpu.dot_dimension_numbers<[1], [0], [0], [1], [0, 0, 1, 1], [], []>} : vector<4x4xbf16>, vector<4x288xbf16>, vector<4x288xf32> -> vector<4x288xf32>
    %36 = arith.addf %29, %35 : vector<4x288xf32>
    %c0_30 = arith.constant 0 : index
    %c0_31 = arith.constant 0 : index
    %c20 = arith.constant 20 : index
    %37 = vector.load %arg1[%c0_30, %c0_31, %c20] : memref<1x4x326xf32, #tpu.memory_space<vmem>>, vector<1x4x288xf32>
    %38 = vector.shape_cast %37 : vector<1x4x288xf32> to vector<4x288xf32>
    %39 = arith.truncf %38 : vector<4x288xf32> to vector<4x288xbf16>
    %c5 = arith.constant 5 : index
    %c0_32 = arith.constant 0 : index
    %c0_33 = arith.constant 0 : index
    %40 = vector.load %arg2[%c5, %c0_32, %c0_33] : memref<9x4x4xbf16, #tpu.memory_space<vmem>>, vector<1x4x4xbf16>
    %41 = vector.shape_cast %40 : vector<1x4x4xbf16> to vector<4x4xbf16>
    %cst_34 = arith.constant dense<0.000000e+00> : vector<4x288xf32>
    %42 = tpu.matmul %41, %39, %cst_34 {dimension_numbers = #tpu.dot_dimension_numbers<[1], [0], [0], [1], [0, 0, 1, 1], [], []>} : vector<4x4xbf16>, vector<4x288xbf16>, vector<4x288xf32> -> vector<4x288xf32>
    %43 = arith.addf %36, %42 : vector<4x288xf32>
    %c0_35 = arith.constant 0 : index
    %c0_36 = arith.constant 0 : index
    %c36 = arith.constant 36 : index
    %44 = vector.load %arg1[%c0_35, %c0_36, %c36] : memref<1x4x326xf32, #tpu.memory_space<vmem>>, vector<1x4x288xf32>
    %45 = vector.shape_cast %44 : vector<1x4x288xf32> to vector<4x288xf32>
    %46 = arith.truncf %45 : vector<4x288xf32> to vector<4x288xbf16>
    %c6 = arith.constant 6 : index
    %c0_37 = arith.constant 0 : index
    %c0_38 = arith.constant 0 : index
    %47 = vector.load %arg2[%c6, %c0_37, %c0_38] : memref<9x4x4xbf16, #tpu.memory_space<vmem>>, vector<1x4x4xbf16>
    %48 = vector.shape_cast %47 : vector<1x4x4xbf16> to vector<4x4xbf16>
    %cst_39 = arith.constant dense<0.000000e+00> : vector<4x288xf32>
    %49 = tpu.matmul %48, %46, %cst_39 {dimension_numbers = #tpu.dot_dimension_numbers<[1], [0], [0], [1], [0, 0, 1, 1], [], []>} : vector<4x4xbf16>, vector<4x288xbf16>, vector<4x288xf32> -> vector<4x288xf32>
    %50 = arith.addf %43, %49 : vector<4x288xf32>
    %c0_40 = arith.constant 0 : index
    %c0_41 = arith.constant 0 : index
    %c37 = arith.constant 37 : index
    %51 = vector.load %arg1[%c0_40, %c0_41, %c37] : memref<1x4x326xf32, #tpu.memory_space<vmem>>, vector<1x4x288xf32>
    %52 = vector.shape_cast %51 : vector<1x4x288xf32> to vector<4x288xf32>
    %53 = arith.truncf %52 : vector<4x288xf32> to vector<4x288xbf16>
    %c7 = arith.constant 7 : index
    %c0_42 = arith.constant 0 : index
    %c0_43 = arith.constant 0 : index
    %54 = vector.load %arg2[%c7, %c0_42, %c0_43] : memref<9x4x4xbf16, #tpu.memory_space<vmem>>, vector<1x4x4xbf16>
    %55 = vector.shape_cast %54 : vector<1x4x4xbf16> to vector<4x4xbf16>
    %cst_44 = arith.constant dense<0.000000e+00> : vector<4x288xf32>
    %56 = tpu.matmul %55, %53, %cst_44 {dimension_numbers = #tpu.dot_dimension_numbers<[1], [0], [0], [1], [0, 0, 1, 1], [], []>} : vector<4x4xbf16>, vector<4x288xbf16>, vector<4x288xf32> -> vector<4x288xf32>
    %57 = arith.addf %50, %56 : vector<4x288xf32>
    %c0_45 = arith.constant 0 : index
    %c0_46 = arith.constant 0 : index
    %c38 = arith.constant 38 : index
    %58 = vector.load %arg1[%c0_45, %c0_46, %c38] : memref<1x4x326xf32, #tpu.memory_space<vmem>>, vector<1x4x288xf32>
    %59 = vector.shape_cast %58 : vector<1x4x288xf32> to vector<4x288xf32>
    %60 = arith.truncf %59 : vector<4x288xf32> to vector<4x288xbf16>
    %c8 = arith.constant 8 : index
    %c0_47 = arith.constant 0 : index
    %c0_48 = arith.constant 0 : index
    %61 = vector.load %arg2[%c8, %c0_47, %c0_48] : memref<9x4x4xbf16, #tpu.memory_space<vmem>>, vector<1x4x4xbf16>
    %62 = vector.shape_cast %61 : vector<1x4x4xbf16> to vector<4x4xbf16>
    %cst_49 = arith.constant dense<0.000000e+00> : vector<4x288xf32>
    %63 = tpu.matmul %62, %60, %cst_49 {dimension_numbers = #tpu.dot_dimension_numbers<[1], [0], [0], [1], [0, 0, 1, 1], [], []>} : vector<4x4xbf16>, vector<4x288xbf16>, vector<4x288xf32> -> vector<4x288xf32>
    %64 = arith.addf %57, %63 : vector<4x288xf32>
    %65 = vector.broadcast %0 : vector<1x288xf32> to vector<4x288xf32>
    %66 = arith.mulf %64, %65 : vector<4x288xf32>
    %67 = arith.truncf %66 : vector<4x288xf32> to vector<4x288xbf16>
    %c0_50 = arith.constant 0 : index
    %c0_51 = arith.constant 0 : index
    %c0_52 = arith.constant 0 : index
    %68 = vector.load %arg4[%c0_50, %c0_51, %c0_52] : memref<1x4x288xbf16, #tpu.memory_space<vmem>>, vector<1x4x288xbf16>
    %69 = vector.shape_cast %68 : vector<1x4x288xbf16> to vector<4x288xbf16>
    %70 = vector.shape_cast %67 : vector<4x288xbf16> to vector<1x4x288xbf16>
    tpu.vector_store %arg4[%c0_50, %c0_51, %c0_52], %70 {strides = array<i32>} : memref<1x4x288xbf16, #tpu.memory_space<vmem>>, vector<1x4x288xbf16>,
    %cst_53 = arith.constant dense<0.000000e+00> : vector<4xf32>
    %71 = vector.multi_reduction <add>, %66, %cst_53 [1] : vector<4x288xf32> to vector<4xf32>
    %72 = vector.shape_cast %71 : vector<4xf32> to vector<4x1xf32>
    %c0_54 = arith.constant 0 : index
    %c0_55 = arith.constant 0 : index
    %c0_56 = arith.constant 0 : index
    %73 = vector.load %arg5[%c0_54, %c0_55, %c0_56] : memref<1x4x2xf32, #tpu.memory_space<vmem>>, vector<1x4x1xf32>
    %74 = vector.shape_cast %73 : vector<1x4x1xf32> to vector<4x1xf32>
    %75 = vector.shape_cast %72 : vector<4x1xf32> to vector<1x4x1xf32>
    tpu.vector_store %arg5[%c0_54, %c0_55, %c0_56], %75 {strides = array<i32>} : memref<1x4x2xf32, #tpu.memory_space<vmem>>, vector<1x4x1xf32>,
    %76 = arith.mulf %66, %66 : vector<4x288xf32>
    %cst_57 = arith.constant dense<0.000000e+00> : vector<4xf32>
    %77 = vector.multi_reduction <add>, %76, %cst_57 [1] : vector<4x288xf32> to vector<4xf32>
    %78 = vector.shape_cast %77 : vector<4xf32> to vector<4x1xf32>
    %c0_58 = arith.constant 0 : index
    %c0_59 = arith.constant 0 : index
    %c1_60 = arith.constant 1 : index
    %79 = vector.load %arg5[%c0_58, %c0_59, %c1_60] : memref<1x4x2xf32, #tpu.memory_space<vmem>>, vector<1x4x1xf32>
    %80 = vector.shape_cast %79 : vector<1x4x1xf32> to vector<4x1xf32>
    %81 = vector.shape_cast %78 : vector<4x1xf32> to vector<1x4x1xf32>
    tpu.vector_store %arg5[%c0_58, %c0_59, %c1_60], %81 {strides = array<i32>} : memref<1x4x2xf32, #tpu.memory_space<vmem>>, vector<1x4x1xf32>,
    return
  }
  func.func @transform_0(%arg0: i32) -> (i32, i32, i32) {
    %c0_i32 = arith.constant 0 : i32
    %c0_i32_0 = arith.constant 0 : i32
    %c0_i32_1 = arith.constant 0 : i32
    return %arg0, %c0_i32, %c0_i32_0 : i32, i32, i32
  }
  func.func @transform_1(%arg0: i32) -> (i32, i32, i32) {
    %c0_i32 = arith.constant 0 : i32
    %c0_i32_0 = arith.constant 0 : i32
    %c0_i32_1 = arith.constant 0 : i32
    %c0_i32_2 = arith.constant 0 : i32
    return %c0_i32, %c0_i32_0, %c0_i32_1 : i32, i32, i32
  }
  func.func @transform_2(%arg0: i32) -> (i32, i32) {
    %c0_i32 = arith.constant 0 : i32
    %c0_i32_0 = arith.constant 0 : i32
    %c0_i32_1 = arith.constant 0 : i32
    return %c0_i32, %c0_i32_0 : i32, i32
  }
  func.func @transform_3(%arg0: i32) -> (i32, i32, i32) {
    %c0_i32 = arith.constant 0 : i32
    %c0_i32_0 = arith.constant 0 : i32
    %c0_i32_1 = arith.constant 0 : i32
    return %arg0, %c0_i32, %c0_i32_0 : i32, i32, i32
  }
  func.func @transform_4(%arg0: i32) -> (i32, i32, i32) {
    %c0_i32 = arith.constant 0 : i32
    %c0_i32_0 = arith.constant 0 : i32
    %c0_i32_1 = arith.constant 0 : i32
    return %arg0, %c0_i32, %c0_i32_0 : i32, i32, i32
  }
}

module attributes {stable_mosaic.version = 11 : i64} {
  func.func @bn_relu_conv3x3_stats_kernel(%arg0: i32, %arg1: memref<1x4x288xbf16, #tpu.memory_space<vmem>>, %arg2: memref<4x1xf32, #tpu.memory_space<vmem>>, %arg3: memref<4x1xf32, #tpu.memory_space<vmem>>, %arg4: memref<9x4x4xbf16, #tpu.memory_space<vmem>>, %arg5: memref<1x288xf32, #tpu.memory_space<vmem>>, %arg6: memref<1x4x288xbf16, #tpu.memory_space<vmem>>, %arg7: memref<1x4x2xf32, #tpu.memory_space<vmem>>, %arg8: memref<4x326xf32, #tpu.memory_space<vmem>>) attributes {dimension_semantics = [#tpu.dimension_semantics<parallel>], iteration_bounds = array<i64: 2>, scalar_prefetch = 0 : i64, scratch_operands = 1 : i64, tpu.core_type = #tpu.core_type<tc>, window_params = [{transform_indices = @transform_0, window_bounds = array<i64: 1, 4, 288>}, {pipeline_mode = #tpu.pipeline_mode<synchronous>, transform_indices = @transform_1, window_bounds = array<i64: 4, 1>}, {pipeline_mode = #tpu.pipeline_mode<synchronous>, transform_indices = @transform_2, window_bounds = array<i64: 4, 1>}, {pipeline_mode = #tpu.pipeline_mode<synchronous>, transform_indices = @transform_3, window_bounds = array<i64: 9, 4, 4>}, {pipeline_mode = #tpu.pipeline_mode<synchronous>, transform_indices = @transform_4, window_bounds = array<i64: 1, 288>}, {transform_indices = @transform_5, window_bounds = array<i64: 1, 4, 288>}, {transform_indices = @transform_6, window_bounds = array<i64: 1, 4, 2>}]} {
    %c0 = arith.constant 0 : index
    %c0_0 = arith.constant 0 : index
    %0 = vector.load %arg5[%c0, %c0_0] : memref<1x288xf32, #tpu.memory_space<vmem>>, vector<1x288xf32>
    %c0_1 = arith.constant 0 : index
    %c0_2 = arith.constant 0 : index
    %c0_3 = arith.constant 0 : index
    %1 = vector.load %arg1[%c0_1, %c0_2, %c0_3] : memref<1x4x288xbf16, #tpu.memory_space<vmem>>, vector<1x4x288xbf16>
    %2 = vector.shape_cast %1 : vector<1x4x288xbf16> to vector<4x288xbf16>
    %3 = arith.extf %2 : vector<4x288xbf16> to vector<4x288xf32>
    %c0_4 = arith.constant 0 : index
    %c0_5 = arith.constant 0 : index
    %4 = vector.load %arg2[%c0_4, %c0_5] : memref<4x1xf32, #tpu.memory_space<vmem>>, vector<4x1xf32>
    %5 = vector.broadcast %4 : vector<4x1xf32> to vector<4x288xf32>
    %6 = arith.mulf %3, %5 : vector<4x288xf32>
    %c0_6 = arith.constant 0 : index
    %c0_7 = arith.constant 0 : index
    %7 = vector.load %arg3[%c0_6, %c0_7] : memref<4x1xf32, #tpu.memory_space<vmem>>, vector<4x1xf32>
    %8 = vector.broadcast %7 : vector<4x1xf32> to vector<4x288xf32>
    %9 = arith.addf %6, %8 : vector<4x288xf32>
    %cst = arith.constant 0.000000e+00 : f32
    %10 = vector.broadcast %cst : f32 to vector<4x288xf32>
    %11 = arith.maximumf %9, %10 : vector<4x288xf32>
    %12 = vector.broadcast %0 : vector<1x288xf32> to vector<4x288xf32>
    %13 = arith.mulf %11, %12 : vector<4x288xf32>
    %cst_8 = arith.constant 0.000000e+00 : f32
    %14 = vector.broadcast %cst_8 : f32 to vector<4x326xf32>
    %c0_9 = arith.constant 0 : index
    %c0_10 = arith.constant 0 : index
    %15 = vector.load %arg8[%c0_9, %c0_10] : memref<4x326xf32, #tpu.memory_space<vmem>>, vector<4x326xf32>
    tpu.vector_store %arg8[%c0_9, %c0_10], %14 {strides = array<i32>} : memref<4x326xf32, #tpu.memory_space<vmem>>, vector<4x326xf32>,
    %c0_11 = arith.constant 0 : index
    %c19 = arith.constant 19 : index
    %16 = vector.load %arg8[%c0_11, %c19] : memref<4x326xf32, #tpu.memory_space<vmem>>, vector<4x288xf32>
    tpu.vector_store %arg8[%c0_11, %c19], %13 {strides = array<i32>} : memref<4x326xf32, #tpu.memory_space<vmem>>, vector<4x288xf32>,
    %cst_12 = arith.constant 0.000000e+00 : f32
    %17 = vector.broadcast %cst_12 : f32 to vector<4x288xf32>
    %c0_13 = arith.constant 0 : index
    %c0_14 = arith.constant 0 : index
    %18 = vector.load %arg8[%c0_13, %c0_14] : memref<4x326xf32, #tpu.memory_space<vmem>>, vector<4x288xf32>
    %19 = arith.truncf %18 : vector<4x288xf32> to vector<4x288xbf16>
    %c0_15 = arith.constant 0 : index
    %c0_16 = arith.constant 0 : index
    %c0_17 = arith.constant 0 : index
    %20 = vector.load %arg4[%c0_15, %c0_16, %c0_17] : memref<9x4x4xbf16, #tpu.memory_space<vmem>>, vector<1x4x4xbf16>
    %21 = vector.shape_cast %20 : vector<1x4x4xbf16> to vector<4x4xbf16>
    %cst_18 = arith.constant dense<0.000000e+00> : vector<4x288xf32>
    %22 = tpu.matmul %21, %19, %cst_18 {dimension_numbers = #tpu.dot_dimension_numbers<[1], [0], [0], [1], [0, 0, 1, 1], [], []>} : vector<4x4xbf16>, vector<4x288xbf16>, vector<4x288xf32> -> vector<4x288xf32>
    %23 = arith.addf %17, %22 : vector<4x288xf32>
    %c0_19 = arith.constant 0 : index
    %c1 = arith.constant 1 : index
    %24 = vector.load %arg8[%c0_19, %c1] : memref<4x326xf32, #tpu.memory_space<vmem>>, vector<4x288xf32>
    %25 = arith.truncf %24 : vector<4x288xf32> to vector<4x288xbf16>
    %c1_20 = arith.constant 1 : index
    %c0_21 = arith.constant 0 : index
    %c0_22 = arith.constant 0 : index
    %26 = vector.load %arg4[%c1_20, %c0_21, %c0_22] : memref<9x4x4xbf16, #tpu.memory_space<vmem>>, vector<1x4x4xbf16>
    %27 = vector.shape_cast %26 : vector<1x4x4xbf16> to vector<4x4xbf16>
    %cst_23 = arith.constant dense<0.000000e+00> : vector<4x288xf32>
    %28 = tpu.matmul %27, %25, %cst_23 {dimension_numbers = #tpu.dot_dimension_numbers<[1], [0], [0], [1], [0, 0, 1, 1], [], []>} : vector<4x4xbf16>, vector<4x288xbf16>, vector<4x288xf32> -> vector<4x288xf32>
    %29 = arith.addf %23, %28 : vector<4x288xf32>
    %c0_24 = arith.constant 0 : index
    %c2 = arith.constant 2 : index
    %30 = vector.load %arg8[%c0_24, %c2] : memref<4x326xf32, #tpu.memory_space<vmem>>, vector<4x288xf32>
    %31 = arith.truncf %30 : vector<4x288xf32> to vector<4x288xbf16>
    %c2_25 = arith.constant 2 : index
    %c0_26 = arith.constant 0 : index
    %c0_27 = arith.constant 0 : index
    %32 = vector.load %arg4[%c2_25, %c0_26, %c0_27] : memref<9x4x4xbf16, #tpu.memory_space<vmem>>, vector<1x4x4xbf16>
    %33 = vector.shape_cast %32 : vector<1x4x4xbf16> to vector<4x4xbf16>
    %cst_28 = arith.constant dense<0.000000e+00> : vector<4x288xf32>
    %34 = tpu.matmul %33, %31, %cst_28 {dimension_numbers = #tpu.dot_dimension_numbers<[1], [0], [0], [1], [0, 0, 1, 1], [], []>} : vector<4x4xbf16>, vector<4x288xbf16>, vector<4x288xf32> -> vector<4x288xf32>
    %35 = arith.addf %29, %34 : vector<4x288xf32>
    %c0_29 = arith.constant 0 : index
    %c18 = arith.constant 18 : index
    %36 = vector.load %arg8[%c0_29, %c18] : memref<4x326xf32, #tpu.memory_space<vmem>>, vector<4x288xf32>
    %37 = arith.truncf %36 : vector<4x288xf32> to vector<4x288xbf16>
    %c3 = arith.constant 3 : index
    %c0_30 = arith.constant 0 : index
    %c0_31 = arith.constant 0 : index
    %38 = vector.load %arg4[%c3, %c0_30, %c0_31] : memref<9x4x4xbf16, #tpu.memory_space<vmem>>, vector<1x4x4xbf16>
    %39 = vector.shape_cast %38 : vector<1x4x4xbf16> to vector<4x4xbf16>
    %cst_32 = arith.constant dense<0.000000e+00> : vector<4x288xf32>
    %40 = tpu.matmul %39, %37, %cst_32 {dimension_numbers = #tpu.dot_dimension_numbers<[1], [0], [0], [1], [0, 0, 1, 1], [], []>} : vector<4x4xbf16>, vector<4x288xbf16>, vector<4x288xf32> -> vector<4x288xf32>
    %41 = arith.addf %35, %40 : vector<4x288xf32>
    %c0_33 = arith.constant 0 : index
    %c19_34 = arith.constant 19 : index
    %42 = vector.load %arg8[%c0_33, %c19_34] : memref<4x326xf32, #tpu.memory_space<vmem>>, vector<4x288xf32>
    %43 = arith.truncf %42 : vector<4x288xf32> to vector<4x288xbf16>
    %c4 = arith.constant 4 : index
    %c0_35 = arith.constant 0 : index
    %c0_36 = arith.constant 0 : index
    %44 = vector.load %arg4[%c4, %c0_35, %c0_36] : memref<9x4x4xbf16, #tpu.memory_space<vmem>>, vector<1x4x4xbf16>
    %45 = vector.shape_cast %44 : vector<1x4x4xbf16> to vector<4x4xbf16>
    %cst_37 = arith.constant dense<0.000000e+00> : vector<4x288xf32>
    %46 = tpu.matmul %45, %43, %cst_37 {dimension_numbers = #tpu.dot_dimension_numbers<[1], [0], [0], [1], [0, 0, 1, 1], [], []>} : vector<4x4xbf16>, vector<4x288xbf16>, vector<4x288xf32> -> vector<4x288xf32>
    %47 = arith.addf %41, %46 : vector<4x288xf32>
    %c0_38 = arith.constant 0 : index
    %c20 = arith.constant 20 : index
    %48 = vector.load %arg8[%c0_38, %c20] : memref<4x326xf32, #tpu.memory_space<vmem>>, vector<4x288xf32>
    %49 = arith.truncf %48 : vector<4x288xf32> to vector<4x288xbf16>
    %c5 = arith.constant 5 : index
    %c0_39 = arith.constant 0 : index
    %c0_40 = arith.constant 0 : index
    %50 = vector.load %arg4[%c5, %c0_39, %c0_40] : memref<9x4x4xbf16, #tpu.memory_space<vmem>>, vector<1x4x4xbf16>
    %51 = vector.shape_cast %50 : vector<1x4x4xbf16> to vector<4x4xbf16>
    %cst_41 = arith.constant dense<0.000000e+00> : vector<4x288xf32>
    %52 = tpu.matmul %51, %49, %cst_41 {dimension_numbers = #tpu.dot_dimension_numbers<[1], [0], [0], [1], [0, 0, 1, 1], [], []>} : vector<4x4xbf16>, vector<4x288xbf16>, vector<4x288xf32> -> vector<4x288xf32>
    %53 = arith.addf %47, %52 : vector<4x288xf32>
    %c0_42 = arith.constant 0 : index
    %c36 = arith.constant 36 : index
    %54 = vector.load %arg8[%c0_42, %c36] : memref<4x326xf32, #tpu.memory_space<vmem>>, vector<4x288xf32>
    %55 = arith.truncf %54 : vector<4x288xf32> to vector<4x288xbf16>
    %c6 = arith.constant 6 : index
    %c0_43 = arith.constant 0 : index
    %c0_44 = arith.constant 0 : index
    %56 = vector.load %arg4[%c6, %c0_43, %c0_44] : memref<9x4x4xbf16, #tpu.memory_space<vmem>>, vector<1x4x4xbf16>
    %57 = vector.shape_cast %56 : vector<1x4x4xbf16> to vector<4x4xbf16>
    %cst_45 = arith.constant dense<0.000000e+00> : vector<4x288xf32>
    %58 = tpu.matmul %57, %55, %cst_45 {dimension_numbers = #tpu.dot_dimension_numbers<[1], [0], [0], [1], [0, 0, 1, 1], [], []>} : vector<4x4xbf16>, vector<4x288xbf16>, vector<4x288xf32> -> vector<4x288xf32>
    %59 = arith.addf %53, %58 : vector<4x288xf32>
    %c0_46 = arith.constant 0 : index
    %c37 = arith.constant 37 : index
    %60 = vector.load %arg8[%c0_46, %c37] : memref<4x326xf32, #tpu.memory_space<vmem>>, vector<4x288xf32>
    %61 = arith.truncf %60 : vector<4x288xf32> to vector<4x288xbf16>
    %c7 = arith.constant 7 : index
    %c0_47 = arith.constant 0 : index
    %c0_48 = arith.constant 0 : index
    %62 = vector.load %arg4[%c7, %c0_47, %c0_48] : memref<9x4x4xbf16, #tpu.memory_space<vmem>>, vector<1x4x4xbf16>
    %63 = vector.shape_cast %62 : vector<1x4x4xbf16> to vector<4x4xbf16>
    %cst_49 = arith.constant dense<0.000000e+00> : vector<4x288xf32>
    %64 = tpu.matmul %63, %61, %cst_49 {dimension_numbers = #tpu.dot_dimension_numbers<[1], [0], [0], [1], [0, 0, 1, 1], [], []>} : vector<4x4xbf16>, vector<4x288xbf16>, vector<4x288xf32> -> vector<4x288xf32>
    %65 = arith.addf %59, %64 : vector<4x288xf32>
    %c0_50 = arith.constant 0 : index
    %c38 = arith.constant 38 : index
    %66 = vector.load %arg8[%c0_50, %c38] : memref<4x326xf32, #tpu.memory_space<vmem>>, vector<4x288xf32>
    %67 = arith.truncf %66 : vector<4x288xf32> to vector<4x288xbf16>
    %c8 = arith.constant 8 : index
    %c0_51 = arith.constant 0 : index
    %c0_52 = arith.constant 0 : index
    %68 = vector.load %arg4[%c8, %c0_51, %c0_52] : memref<9x4x4xbf16, #tpu.memory_space<vmem>>, vector<1x4x4xbf16>
    %69 = vector.shape_cast %68 : vector<1x4x4xbf16> to vector<4x4xbf16>
    %cst_53 = arith.constant dense<0.000000e+00> : vector<4x288xf32>
    %70 = tpu.matmul %69, %67, %cst_53 {dimension_numbers = #tpu.dot_dimension_numbers<[1], [0], [0], [1], [0, 0, 1, 1], [], []>} : vector<4x4xbf16>, vector<4x288xbf16>, vector<4x288xf32> -> vector<4x288xf32>
    %71 = arith.addf %65, %70 : vector<4x288xf32>
    %72 = vector.broadcast %0 : vector<1x288xf32> to vector<4x288xf32>
    %73 = arith.mulf %71, %72 : vector<4x288xf32>
    %74 = arith.truncf %73 : vector<4x288xf32> to vector<4x288xbf16>
    %c0_54 = arith.constant 0 : index
    %c0_55 = arith.constant 0 : index
    %c0_56 = arith.constant 0 : index
    %75 = vector.load %arg6[%c0_54, %c0_55, %c0_56] : memref<1x4x288xbf16, #tpu.memory_space<vmem>>, vector<1x4x288xbf16>
    %76 = vector.shape_cast %75 : vector<1x4x288xbf16> to vector<4x288xbf16>
    %77 = vector.shape_cast %74 : vector<4x288xbf16> to vector<1x4x288xbf16>
    tpu.vector_store %arg6[%c0_54, %c0_55, %c0_56], %77 {strides = array<i32>} : memref<1x4x288xbf16, #tpu.memory_space<vmem>>, vector<1x4x288xbf16>,
    %cst_57 = arith.constant dense<0.000000e+00> : vector<4xf32>
    %78 = vector.multi_reduction <add>, %73, %cst_57 [1] : vector<4x288xf32> to vector<4xf32>
    %79 = vector.shape_cast %78 : vector<4xf32> to vector<4x1xf32>
    %c0_58 = arith.constant 0 : index
    %c0_59 = arith.constant 0 : index
    %c0_60 = arith.constant 0 : index
    %80 = vector.load %arg7[%c0_58, %c0_59, %c0_60] : memref<1x4x2xf32, #tpu.memory_space<vmem>>, vector<1x4x1xf32>
    %81 = vector.shape_cast %80 : vector<1x4x1xf32> to vector<4x1xf32>
    %82 = vector.shape_cast %79 : vector<4x1xf32> to vector<1x4x1xf32>
    tpu.vector_store %arg7[%c0_58, %c0_59, %c0_60], %82 {strides = array<i32>} : memref<1x4x2xf32, #tpu.memory_space<vmem>>, vector<1x4x1xf32>,
    %83 = arith.mulf %73, %73 : vector<4x288xf32>
    %cst_61 = arith.constant dense<0.000000e+00> : vector<4xf32>
    %84 = vector.multi_reduction <add>, %83, %cst_61 [1] : vector<4x288xf32> to vector<4xf32>
    %85 = vector.shape_cast %84 : vector<4xf32> to vector<4x1xf32>
    %c0_62 = arith.constant 0 : index
    %c0_63 = arith.constant 0 : index
    %c1_64 = arith.constant 1 : index
    %86 = vector.load %arg7[%c0_62, %c0_63, %c1_64] : memref<1x4x2xf32, #tpu.memory_space<vmem>>, vector<1x4x1xf32>
    %87 = vector.shape_cast %86 : vector<1x4x1xf32> to vector<4x1xf32>
    %88 = vector.shape_cast %85 : vector<4x1xf32> to vector<1x4x1xf32>
    tpu.vector_store %arg7[%c0_62, %c0_63, %c1_64], %88 {strides = array<i32>} : memref<1x4x2xf32, #tpu.memory_space<vmem>>, vector<1x4x1xf32>,
    return
  }
  func.func @transform_0(%arg0: i32) -> (i32, i32, i32) {
    %c0_i32 = arith.constant 0 : i32
    %c0_i32_0 = arith.constant 0 : i32
    %c0_i32_1 = arith.constant 0 : i32
    return %arg0, %c0_i32, %c0_i32_0 : i32, i32, i32
  }
  func.func @transform_1(%arg0: i32) -> (i32, i32) {
    %c0_i32 = arith.constant 0 : i32
    %c0_i32_0 = arith.constant 0 : i32
    %c0_i32_1 = arith.constant 0 : i32
    return %c0_i32, %c0_i32_0 : i32, i32
  }
  func.func @transform_2(%arg0: i32) -> (i32, i32) {
    %c0_i32 = arith.constant 0 : i32
    %c0_i32_0 = arith.constant 0 : i32
    %c0_i32_1 = arith.constant 0 : i32
    return %c0_i32, %c0_i32_0 : i32, i32
  }
  func.func @transform_3(%arg0: i32) -> (i32, i32, i32) {
    %c0_i32 = arith.constant 0 : i32
    %c0_i32_0 = arith.constant 0 : i32
    %c0_i32_1 = arith.constant 0 : i32
    %c0_i32_2 = arith.constant 0 : i32
    return %c0_i32, %c0_i32_0, %c0_i32_1 : i32, i32, i32
  }
  func.func @transform_4(%arg0: i32) -> (i32, i32) {
    %c0_i32 = arith.constant 0 : i32
    %c0_i32_0 = arith.constant 0 : i32
    %c0_i32_1 = arith.constant 0 : i32
    return %c0_i32, %c0_i32_0 : i32, i32
  }
  func.func @transform_5(%arg0: i32) -> (i32, i32, i32) {
    %c0_i32 = arith.constant 0 : i32
    %c0_i32_0 = arith.constant 0 : i32
    %c0_i32_1 = arith.constant 0 : i32
    return %arg0, %c0_i32, %c0_i32_0 : i32, i32, i32
  }
  func.func @transform_6(%arg0: i32) -> (i32, i32, i32) {
    %c0_i32 = arith.constant 0 : i32
    %c0_i32_0 = arith.constant 0 : i32
    %c0_i32_1 = arith.constant 0 : i32
    return %arg0, %c0_i32, %c0_i32_0 : i32, i32, i32
  }
}

module attributes {stable_mosaic.version = 11 : i64} {
  func.func @bn_add_relu_kernel(%arg0: i32, %arg1: memref<1x4x288xbf16, #tpu.memory_space<vmem>>, %arg2: memref<4x1xf32, #tpu.memory_space<vmem>>, %arg3: memref<4x1xf32, #tpu.memory_space<vmem>>, %arg4: memref<1x4x288xf32, #tpu.memory_space<vmem>>, %arg5: memref<1x4x288xf32, #tpu.memory_space<vmem>>) attributes {dimension_semantics = [#tpu.dimension_semantics<parallel>], iteration_bounds = array<i64: 2>, scalar_prefetch = 0 : i64, scratch_operands = 0 : i64, tpu.core_type = #tpu.core_type<tc>, window_params = [{transform_indices = @transform_0, window_bounds = array<i64: 1, 4, 288>}, {pipeline_mode = #tpu.pipeline_mode<synchronous>, transform_indices = @transform_1, window_bounds = array<i64: 4, 1>}, {pipeline_mode = #tpu.pipeline_mode<synchronous>, transform_indices = @transform_2, window_bounds = array<i64: 4, 1>}, {transform_indices = @transform_3, window_bounds = array<i64: 1, 4, 288>}, {transform_indices = @transform_4, window_bounds = array<i64: 1, 4, 288>}]} {
    %c0 = arith.constant 0 : index
    %c0_0 = arith.constant 0 : index
    %c0_1 = arith.constant 0 : index
    %0 = vector.load %arg1[%c0, %c0_0, %c0_1] : memref<1x4x288xbf16, #tpu.memory_space<vmem>>, vector<1x4x288xbf16>
    %1 = vector.shape_cast %0 : vector<1x4x288xbf16> to vector<4x288xbf16>
    %2 = arith.extf %1 : vector<4x288xbf16> to vector<4x288xf32>
    %c0_2 = arith.constant 0 : index
    %c0_3 = arith.constant 0 : index
    %3 = vector.load %arg2[%c0_2, %c0_3] : memref<4x1xf32, #tpu.memory_space<vmem>>, vector<4x1xf32>
    %4 = vector.broadcast %3 : vector<4x1xf32> to vector<4x288xf32>
    %5 = arith.mulf %2, %4 : vector<4x288xf32>
    %c0_4 = arith.constant 0 : index
    %c0_5 = arith.constant 0 : index
    %6 = vector.load %arg3[%c0_4, %c0_5] : memref<4x1xf32, #tpu.memory_space<vmem>>, vector<4x1xf32>
    %7 = vector.broadcast %6 : vector<4x1xf32> to vector<4x288xf32>
    %8 = arith.addf %5, %7 : vector<4x288xf32>
    %c0_6 = arith.constant 0 : index
    %c0_7 = arith.constant 0 : index
    %c0_8 = arith.constant 0 : index
    %9 = vector.load %arg4[%c0_6, %c0_7, %c0_8] : memref<1x4x288xf32, #tpu.memory_space<vmem>>, vector<1x4x288xf32>
    %10 = vector.shape_cast %9 : vector<1x4x288xf32> to vector<4x288xf32>
    %11 = arith.addf %8, %10 : vector<4x288xf32>
    %cst = arith.constant 0.000000e+00 : f32
    %12 = vector.broadcast %cst : f32 to vector<4x288xf32>
    %13 = arith.maximumf %11, %12 : vector<4x288xf32>
    %c0_9 = arith.constant 0 : index
    %c0_10 = arith.constant 0 : index
    %c0_11 = arith.constant 0 : index
    %14 = vector.load %arg5[%c0_9, %c0_10, %c0_11] : memref<1x4x288xf32, #tpu.memory_space<vmem>>, vector<1x4x288xf32>
    %15 = vector.shape_cast %14 : vector<1x4x288xf32> to vector<4x288xf32>
    %16 = vector.shape_cast %13 : vector<4x288xf32> to vector<1x4x288xf32>
    tpu.vector_store %arg5[%c0_9, %c0_10, %c0_11], %16 {strides = array<i32>} : memref<1x4x288xf32, #tpu.memory_space<vmem>>, vector<1x4x288xf32>,
    return
  }
  func.func @transform_0(%arg0: i32) -> (i32, i32, i32) {
    %c0_i32 = arith.constant 0 : i32
    %c0_i32_0 = arith.constant 0 : i32
    %c0_i32_1 = arith.constant 0 : i32
    return %arg0, %c0_i32, %c0_i32_0 : i32, i32, i32
  }
  func.func @transform_1(%arg0: i32) -> (i32, i32) {
    %c0_i32 = arith.constant 0 : i32
    %c0_i32_0 = arith.constant 0 : i32
    %c0_i32_1 = arith.constant 0 : i32
    return %c0_i32, %c0_i32_0 : i32, i32
  }
  func.func @transform_2(%arg0: i32) -> (i32, i32) {
    %c0_i32 = arith.constant 0 : i32
    %c0_i32_0 = arith.constant 0 : i32
    %c0_i32_1 = arith.constant 0 : i32
    return %c0_i32, %c0_i32_0 : i32, i32
  }
  func.func @transform_3(%arg0: i32) -> (i32, i32, i32) {
    %c0_i32 = arith.constant 0 : i32
    %c0_i32_0 = arith.constant 0 : i32
    %c0_i32_1 = arith.constant 0 : i32
    return %arg0, %c0_i32, %c0_i32_0 : i32, i32, i32
  }
  func.func @transform_4(%arg0: i32) -> (i32, i32, i32) {
    %c0_i32 = arith.constant 0 : i32
    %c0_i32_0 = arith.constant 0 : i32
    %c0_i32_1 = arith.constant 0 : i32
    return %arg0, %c0_i32, %c0_i32_0 : i32, i32, i32
  }
}

</mosaic_0001>

<bundles_post_ra>
// kernel: residual_block_forward.5
= control target key start
LH: loop header
LB: loop body
LE: loop exit
PB: predicated region body
PF: predicated region fallthrough
CT: control target
= control target key end

     0   :  { %s379_s15 = smov 0   ;;  %s405_s0 = inlined_call_operand.vmem [shape: bf16[2,4,288], index: 0, kind: input, shape index: {}]   ;;  %s406_s1 = inlined_call_operand.vmem [shape: f32[4,1], index: 1, kind: input, shape index: {}]   ;;  %s407_s2 = inlined_call_operand.vmem [shape: f32[4,1], index: 2, kind: input, shape index: {}]   ;;  %s408_s3 = inlined_call_operand.vmem [shape: f32[2,4,288], index: 3, kind: input, shape index: {}]   ;;  %s409_s4 = inlined_call_operand.vmem [shape: f32[2,4,288], index: 4, kind: output, shape index: {}]  }
   0x1 LB: > { %s321_s16 = sadd.s32 4294967295, %s350_s15   ;;  %p325_p0 = scmp.ge.s32.totalorder %s350_s15, 1  ;;  %s350_s15 = sphi %s379_s15, %s14_s15  }
   0x2   : > { %p172_p1 = scmp.lt.s32.totalorder %s350_s15, 3 }
   0x4   : > { %p173_p2 = pnand %p325_p0, %p172_p1 }
   0x5   : > { %p203_p3 = scmp.lt.s32.totalorder (!%p173_p2), %s321_s16, 1 }
   0x6   : > { %176 = sbr.rel (%p173_p2) target bundleno = 146 (0x92), region = 36 }
   0xb   : > { %v221_v0 = vld [vmem:[%s406_s1] sm:$0xf]  ;;  %v352_v1 = vmov 0   ;;  %s411_s16 = smov (!%p203_p3, %s321_s16), 1  ;;  %v353_v3 = vmov 839922192  }
   0xc   : > { %343 = vset.pattern.permute.xlu0 %v352_v1  ;;  %v233_v2 = vld [vmem:[%s407_s2] sm:$0xf]  ;;  %s331_s21 = smul.u32 6, %s411_s16  ;;  %v227_v4 = vunpack.c.l.s4 %v353_v3  ;;  %vm252_vm0 = vcmask 257024  }
   0xd   : > { %224 = vperm.xlu0 %343, %v221_v0   ;;  %s332_s25 = smul.u32 12, %s411_s16 }
   0xe   : > { %s207_s24 = scalar_lea.vmem %s405_s0, %s331_s21  ;;  %v228_v6 = vunpack.c.0.s8 %v227_v4 }
   0xf   : > { %v218_v7 = vld [vmem:[%s207_s24] sm:$0x3f]  ;;  %s212_s28 = scalar_lea.vmem %s408_s3, %s332_s25  ;;  %s217_s5 = scalar_lea.vmem %s409_s4, %s332_s25 }
  0x10   : > { %v219_v8 = vunpack.c.l.bf16 %v218_v7  ;;  %v220_v9 = vunpack.c.h.bf16 %v218_v7  ;;  %v245_v15 = vld [vmem:[%s212_s28] sm:$0xff]  ;;  %v246_v16 = vld [vmem:[%s212_s28 + $0x8] sm:$0xf] }
  0x15   : > { %236 = vperm.xlu0 %343, %v233_v2  }
  0x7f   : > { %v225_v5 = vpop.permute.xlu0 %224 }
  0x80   : > { %v229_v10 = vperm.slane %v225_v5, %v228_v6 }
  0x82   : > { %v231_v12 = vmul.f32 %v229_v10, %v219_v8  ;;  %v232_v13 = vmul.f32 %v229_v10, %v220_v9 }
  0x87   : > { %v237_v11 = vpop.permute.xlu0 %236 }
  0x88   : > { %v241_v14 = vperm.slane %v237_v11, %v228_v6 }
  0x8a   : > { %v243_v17 = vadd.f32 %v241_v14, %v231_v12  ;;  %v244_v18 = vadd.f32 %v241_v14, %v232_v13 }
  0x8c   : > { %v247_v19 = vadd.f32 %v245_v15, %v243_v17  ;;  %v248_v20 = vadd.f32 %v246_v16, %v244_v18 }
  0x8e   : > { %v249_v21 = vmax.f32 %v247_v19, 0.0  ;;  %v250_v22 = vmax.f32 %v248_v20, 0.0 }
  0x90   : > { %251 = vst [vmem:[%s217_s5] sm:$0xff] %v249_v21 }
  0x91   : > { %253 = vst.msk [vmem:[%s217_s5 + $0x8] sm:$0xf] %vm252_vm0, %v250_v22 }
  0x92 PF: > { %s14_s15 = sadd.s32 1, %s350_s15  }
  0x93   : > { %p11_p4 = scmp.ge.s32.totalorder %s14_s15, 4  }
  0x95   :  { %13 = sbr.rel (!%p11_p4) target bundleno = 1 (0x1), region = 69 }

// kernel: residual_block_forward.3
= control target key start
LH: loop header
LB: loop body
LE: loop exit
PB: predicated region body
PF: predicated region fallthrough
CT: control target
= control target key end

     0   :  { %s1194_s15 = smov 0   ;;  %s1362_s0 = inlined_call_operand.vmem [shape: f32[2,4,326], index: 0, kind: input, shape index: {}]   ;;  %s1363_s1 = inlined_call_operand.vmem [shape: bf16[9,4,4], index: 1, kind: input, shape index: {}]   ;;  %s1364_s2 = inlined_call_operand.vmem [shape: f32[1,288], index: 2, kind: input, shape index: {}]   ;;  %s1365_s3 = inlined_call_operand.vmem [shape: bf16[2,4,288], index: 3, kind: output, shape index: {0}]   ;;  %s1366_s4 = inlined_call_operand.vmem [shape: f32[2,4,2], index: 4, kind: output, shape index: {1}]  }
   0x1 LB: > { %s1090_s16 = sadd.s32 4294967295, %s1159_s15   ;;  %p1094_p0 = scmp.ge.s32.totalorder %s1159_s15, 1  ;;  %s1159_s15 = sphi %s1194_s15, %s15_s15  }
   0x2   : > { %p165_p1 = scmp.lt.s32.totalorder %s1159_s15, 3 }
   0x4   : > { %p166_p2 = pnand %p1094_p0, %p165_p1 }
   0x5   : > { %p195_p3 = scmp.lt.s32.totalorder (!%p166_p2), %s1090_s16, 1  ;;  %s1161_s21 = smov (!%p166_p2), 127  }
   0x6   : > { %169 = sbr.rel (%p166_p2) target bundleno = 512 (0x200), region = 32  ;;  %s1162_s22 = smov (!%p166_p2), 126  }
   0x7   : > { %s1163_s23 = smov (!%p166_p2), 110   ;;  %s1164_s24 = smov (!%p166_p2), 109  }
   0x8   : > { %s1165_s25 = smov (!%p166_p2), 108   ;;  %s1166_s26 = smov (!%p166_p2), 92  }
   0x9   : > { %s1167_s27 = smov (!%p166_p2), 91   ;;  %s1168_s28 = smov (!%p166_p2), 90  }
   0xb   : > { %s1368_s16 = smov (!%p195_p3, %s1090_s16), 1  ;;  %vm262_vm0 = vcmask 1041408   ;;  %vm258_vm1 = vcmask 31744   ;;  %v1243_v63 = vld [vmem:[%s1363_s1] sm:$0x3]  ;;  %vm389_vm2 = vcmask 1031168  }
   0xc   : > { %s1135_s17 = smul.u32 12, %s1368_s16  ;;  %vm255_vm3 = vcmask 1039360   ;;  %vm473_vm4 = vcmask 900096   ;;  %vm557_vm5 = vcmask 891904   ;;  %vm641_vm6 = vcmask 883712   ;;  %s1097_s29 = sshll.u32 %s1368_s16, 2 }
   0xd   : > { %vm725_vm7 = vcmask 752640   ;;  %vm809_vm8 = vcmask 744448   ;;  %vm893_vm9 = vcmask 736256   ;;  %vm974_vm10 = vcmask 1043456   ;;  %s208_s6 = scalar_lea.vmem %s1366_s4, %s1097_s29 }
   0xe   : > { %s1208_s20 = scalar_lea.vmem %s1362_s0, %s1135_s17  ;;  %vm977_vm11 = vcmask 1043458   ;;  %vm985_vm12 = vcmask 257024   ;;  %vm979_vm13 = vcmask 259076   ;;  %vm970_vm15 = vcmask 1045508  }
   0xf   : > { %v212_v0 = vld [vmem:[%s1208_s20 + $0x8] sm:$0xf]  ;;  %v1212_v1 = vld [vmem:[%s1208_s20] sm:$0xff]  ;;  %vm978_vm14 = vmor %vm977_vm11, %vm262_vm0 }
  0x10   : > { %217 = vst [vmem:[#allocation1 + $0x10] ss:$2 sm:$0xff] %v212_v0  ;;  %v229_v2 = vld [vmem:[%s1208_s20 + $0x8] sm:$0xf] }
  0x11   : > { %215 = vst [vmem:[#allocation1] ss:$2 sm:$0xff] %v1212_v1  ;;  %v363_v6 = vld [vmem:[%s1208_s20 + $0x8] sm:$0xf] }
  0x12   : > { %v447_v12 = vld [vmem:[%s1208_s20 + $0x8] sm:$0xf] }
  0x13   : > { %v531_v19 = vld [vmem:[%s1208_s20 + $0x8] sm:$0xf] }
  0x14   : > { %v615_v26 = vld [vmem:[%s1208_s20 + $0x8] sm:$0xf] }
  0x15   : > { %v699_v33 = vld [vmem:[%s1208_s20 + $0x8] sm:$0xf] }
  0x16   : > { %v783_v40 = vld [vmem:[%s1208_s20 + $0x8] sm:$0xf] }
  0x17   : > { %v1216_v3 = vld.sshfl [vmem:[#allocation1 + $0x10] sm:$0xff pattern:$0x75316420]  ;;  %v867_v47 = vld [vmem:[%s1208_s20 + $0x8] sm:$0xf] }
  0x18   : > { %234 = vst [vmem:[#allocation1 + $0x10] ss:$2 sm:$0xff] %v229_v2  ;;  %v1218_v4 = vld.sshfl [vmem:[#allocation1] sm:$0xff pattern:$0x75316420] }
  0x19   : > { %v1220_v5 = vld.sshfl [vmem:[#allocation1 + $0x8] sm:$0xff pattern:$0x75316420]  ;;  %v224_v61 = vpack.c.bf16 %v1218_v4, %v1218_v4 }
  0x1a   : > { %232 = vst [vmem:[#allocation1] ss:$2 sm:$0xff] %v1212_v1 }
  0x1b   : > { %v315_v62 = vsel %vm262_vm0, %v224_v61, 0 }
  0x1c   : > { %330 = vmatpush.bf16.msra.mxu3 %v315_v62 }
  0x1f   : > { %v237_v7 = vld.sshfl [vmem:[#allocation1 + $0x10] sm:$0xff pattern:$0x75316420]  ;;  %1102 = vmatmul.msk.bf16.vlgmr.msra.gmra.mxu3 %vm258_vm1, %v1243_v63 }
  0x20   : > { %v243_v8 = vpack.c.bf16 %v237_v7, %v237_v7  ;;  %368 = vst [vmem:[#allocation1 + $0x10] ss:$2 sm:$0xff] %v363_v6  ;;  %v226_v6 = vpack.c.bf16 %v1216_v3, %v1216_v3 }
  0x21   : > { %v236_v9 = vld.sshfl [vmem:[#allocation1 + $0x8] sm:$0xff pattern:$0x75316420]  ;;  %v235_v10 = vld.sshfl [vmem:[#allocation1] sm:$0xff pattern:$0x75316420] }
  0x22   : > { %253 = vrot.lane.b32.xlu0 %v243_v8, %s1161_s21  ;;  %v242_v11 = vpack.c.bf16 %v236_v9, %v236_v9  ;;  %366 = vst [vmem:[#allocation1] ss:$2 sm:$0xff] %v1212_v1  ;;  %v241_v13 = vpack.c.bf16 %v235_v10, %v235_v10  ;;  %v1254_v8 = vld [vmem:[%s1363_s1 + $0x4] sm:$0x3] }
  0x24   : > { %251 = vrot.lane.b32.xlu1 %v242_v11, %s1161_s21  ;;  %v1098_v11 = vld [vmem:[%s1363_s1 + $0x2] sm:$0x3] }
  0x27   : > { %v371_v14 = vld.sshfl [vmem:[#allocation1 + $0x10] sm:$0xff pattern:$0x75316420] }
  0x28   : > { %452 = vst [vmem:[#allocation1 + $0x10] ss:$2 sm:$0xff] %v447_v12  ;;  %v377_v24 = vpack.c.bf16 %v371_v14, %v371_v14  ;;  %v321_v12 = vsel %vm262_vm0, %v226_v6, 0  ;;  %v225_v14 = vpack.c.bf16 %v1220_v5, %v1220_v5 }
  0x29   : > { %v369_v15 = vld.sshfl [vmem:[#allocation1] sm:$0xff pattern:$0x75316420]  ;;  %v370_v16 = vld.sshfl [vmem:[#allocation1 + $0x8] sm:$0xff pattern:$0x75316420] }
  0x2a   : > { %v375_v17 = vpack.c.bf16 %v369_v15, %v369_v15  ;;  %249 = vrot.lane.b32.xlu0 %v241_v13, %s1161_s21  ;;  %v376_v18 = vpack.c.bf16 %v370_v16, %v370_v16  ;;  %450 = vst [vmem:[#allocation1] ss:$2 sm:$0xff] %v1212_v1 }
  0x2c   : > { %383 = vrot.lane.b32.xlu1 %v375_v17, %s1162_s22  ;;  %385 = vrot.lane.b32.xlu2 %v376_v18, %s1162_s22  ;;  %v318_v17 = vsel %vm262_vm0, %v225_v14, 0 }
  0x2f   : > { %v455_v20 = vld.sshfl [vmem:[#allocation1 + $0x10] sm:$0xff pattern:$0x75316420] }
  0x30   : > { %v461_v21 = vpack.c.bf16 %v455_v20, %v455_v20  ;;  %536 = vst [vmem:[#allocation1 + $0x10] ss:$2 sm:$0xff] %v531_v19 }
  0x31   : > { %v453_v22 = vld.sshfl [vmem:[#allocation1] sm:$0xff pattern:$0x75316420]  ;;  %v454_v23 = vld.sshfl [vmem:[#allocation1 + $0x8] sm:$0xff pattern:$0x75316420] }
  0x32   : > { %v460_v25 = vpack.c.bf16 %v454_v23, %v454_v23  ;;  %534 = vst [vmem:[#allocation1] ss:$2 sm:$0xff] %v1212_v1  ;;  %v459_v31 = vpack.c.bf16 %v453_v22, %v453_v22 }
  0x34   : > { %471 = vrot.lane.b32.xlu1 %v461_v21, %s1163_s23  ;;  %469 = vrot.lane.b32.xlu0 %v460_v25, %s1163_s23 }
  0x35   : > { %387 = vrot.lane.b32.xlu2 %v377_v24, %s1162_s22 }
  0x37   : > { %v539_v27 = vld.sshfl [vmem:[#allocation1 + $0x10] sm:$0xff pattern:$0x75316420] }
  0x38   : > { %v545_v28 = vpack.c.bf16 %v539_v27, %v539_v27  ;;  %620 = vst [vmem:[#allocation1 + $0x10] ss:$2 sm:$0xff] %v615_v26 }
  0x39   : > { %v538_v29 = vld.sshfl [vmem:[#allocation1 + $0x8] sm:$0xff pattern:$0x75316420]  ;;  %v537_v30 = vld.sshfl [vmem:[#allocation1] sm:$0xff pattern:$0x75316420] }
  0x3a   : > { %v543_v32 = vpack.c.bf16 %v537_v30, %v537_v30  ;;  %618 = vst [vmem:[#allocation1] ss:$2 sm:$0xff] %v1212_v1  ;;  %v544_v37 = vpack.c.bf16 %v538_v29, %v538_v29  ;;  %v1109_v30 = vld [vmem:[%s1363_s1 + $0x6] sm:$0x3] }
  0x3c   : > { %551 = vrot.lane.b32.xlu1 %v543_v32, %s1164_s24  ;;  %555 = vrot.lane.b32.xlu0 %v545_v28, %s1164_s24 }
  0x3d   : > { %467 = vrot.lane.b32.xlu2 %v459_v31, %s1163_s23 }
  0x3f   : > { %v623_v34 = vld.sshfl [vmem:[#allocation1 + $0x10] sm:$0xff pattern:$0x75316420] }
  0x40   : > { %704 = vst [vmem:[#allocation1 + $0x10] ss:$2 sm:$0xff] %v699_v33  ;;  %v629_v42 = vpack.c.bf16 %v623_v34, %v623_v34 }
  0x41   : > { %v622_v35 = vld.sshfl [vmem:[#allocation1 + $0x8] sm:$0xff pattern:$0x75316420]  ;;  %v621_v36 = vld.sshfl [vmem:[#allocation1] sm:$0xff pattern:$0x75316420] }
  0x42   : > { %v628_v38 = vpack.c.bf16 %v622_v35, %v622_v35  ;;  %v627_v39 = vpack.c.bf16 %v621_v36, %v621_v36  ;;  %702 = vst [vmem:[#allocation1] ss:$2 sm:$0xff] %v1212_v1 }
  0x44   : > { %637 = vrot.lane.b32.xlu1 %v628_v38, %s1165_s25  ;;  %635 = vrot.lane.b32.xlu0 %v627_v39, %s1165_s25 }
  0x45   : > { %553 = vrot.lane.b32.xlu2 %v544_v37, %s1164_s24 }
  0x47   : > { %v707_v41 = vld.sshfl [vmem:[#allocation1 + $0x10] sm:$0xff pattern:$0x75316420] }
  0x48   : > { %788 = vst [vmem:[#allocation1 + $0x10] ss:$2 sm:$0xff] %v783_v40  ;;  %v713_v52 = vpack.c.bf16 %v707_v41, %v707_v41 }
  0x49   : > { %v706_v43 = vld.sshfl [vmem:[#allocation1 + $0x8] sm:$0xff pattern:$0x75316420]  ;;  %v705_v44 = vld.sshfl [vmem:[#allocation1] sm:$0xff pattern:$0x75316420] }
  0x4a   : > { %v712_v45 = vpack.c.bf16 %v706_v43, %v706_v43  ;;  %v711_v46 = vpack.c.bf16 %v705_v44, %v705_v44  ;;  %786 = vst [vmem:[#allocation1] ss:$2 sm:$0xff] %v1212_v1  ;;  %v1117_v44 = vld [vmem:[%s1363_s1 + $0xa] sm:$0x3] }
  0x4c   : > { %639 = vrot.lane.b32.xlu1 %v629_v42, %s1165_s25  ;;  %721 = vrot.lane.b32.xlu0 %v712_v45, %s1166_s26  ;;  %s1136_s25 = smul.u32 6, %s1368_s16 }
  0x4d   : > { %719 = vrot.lane.b32.xlu2 %v711_v46, %s1166_s26 }
  0x4f   : > { %v791_v48 = vld.sshfl [vmem:[#allocation1 + $0x10] sm:$0xff pattern:$0x75316420] }
  0x50   : > { %v797_v49 = vpack.c.bf16 %v791_v48, %v791_v48  ;;  %872 = vst [vmem:[#allocation1 + $0x10] ss:$2 sm:$0xff] %v867_v47 }
  0x51   : > { %v789_v50 = vld.sshfl [vmem:[#allocation1] sm:$0xff pattern:$0x75316420]  ;;  %v790_v51 = vld.sshfl [vmem:[#allocation1 + $0x8] sm:$0xff pattern:$0x75316420] }
  0x52   : > { %v796_v53 = vpack.c.bf16 %v790_v51, %v790_v51  ;;  %870 = vst [vmem:[#allocation1] ss:$2 sm:$0xff] %v1212_v1  ;;  %v795_v57 = vpack.c.bf16 %v789_v50, %v789_v50 }
  0x54   : > { %807 = vrot.lane.b32.xlu1 %v797_v49, %s1167_s27  ;;  %805 = vrot.lane.b32.xlu0 %v796_v53, %s1167_s27 }
  0x55   : > { %723 = vrot.lane.b32.xlu2 %v713_v52, %s1166_s26 }
  0x57   : > { %v875_v54 = vld.sshfl [vmem:[#allocation1 + $0x10] sm:$0xff pattern:$0x75316420] }
  0x58   : > { %v881_v55 = vpack.c.bf16 %v875_v54, %v875_v54 }
  0x59   : > { %v873_v56 = vld.sshfl [vmem:[#allocation1] sm:$0xff pattern:$0x75316420]  ;;  %v874_v59 = vld.sshfl [vmem:[#allocation1 + $0x8] sm:$0xff pattern:$0x75316420] }
  0x5a   : > { %v879_v58 = vpack.c.bf16 %v873_v56, %v873_v56  ;;  %v880_v60 = vpack.c.bf16 %v874_v59, %v874_v59  ;;  %v1113_v56 = vld [vmem:[%s1363_s1 + $0x8] sm:$0x3] }
  0x5c   : > { %891 = vrot.lane.b32.xlu0 %v881_v55, %s1168_s28  ;;  %887 = vrot.lane.b32.xlu1 %v879_v58, %s1168_s28 }
  0x5d   : > { %803 = vrot.lane.b32.xlu2 %v795_v57, %s1167_s27 }
  0x65   : > { %889 = vrot.lane.b32.xlu2 %v880_v60, %s1168_s28  ;;  %s204_s28 = scalar_lea.vmem %s1365_s3, %s1136_s25 }
  0x86   : > { %v386_v0 = vpop.permute.xlu2 %385 }
  0x8f   : > { %v388_v1 = vpop.permute.xlu2 %387 }
  0x90   : > { %v391_v2 = vsel %vm389_vm2, %v386_v0, %v388_v1  ;;  %v402_v21 = vsel %vm262_vm0, %v388_v1, 0 }
  0x91   : > { %v399_v4 = vsel %vm262_vm0, %v391_v2, 0 }
  0x92   : > { %424 = vmatpush.bf16.msrb.mxu3 %v399_v4 }
  0x94   : > { %v254_v7 = vpop.permute.xlu0 %253 }
  0x95   : > { %v270_v9 = vsel %vm262_vm0, %v254_v7, 0  ;;  %1107 = vmatmul.msk.bf16.vlgmr.msrb.gmra.mxu3 %vm258_vm1, %v1254_v8 }
  0x96   : > { %v252_v10 = vpop.permute.xlu1 %251  ;;  %305 = vmatpush.bf16.msra.mxu2 %v270_v9 }
  0x97   : > { %v257_v3 = vsel %vm255_vm3, %v252_v10, %v254_v7  ;;  %v468_v5 = vpop.permute.xlu2 %467 }
  0x98   : > { %v267_v13 = vsel %vm262_vm0, %v257_v3, 0 }
  0x99   : > { %292 = vmatpush.bf16.msra.mxu1 %v267_v13  ;;  %1101 = vmatmul.msk.bf16.vlgmr.msra.gmra.mxu2 %vm258_vm1, %v1098_v11 }
  0x9c   : > { %1100 = vmatmul.msk.bf16.vlgmr.msra.gmra.mxu1 %vm258_vm1, %v1098_v11  ;;  %v250_v15 = vpop.permute.xlu0 %249 }
  0x9d   : > { %356 = vmatpush.bf16.msrb.mxu1 %v321_v12  ;;  %v256_v16 = vsel %vm255_vm3, %v250_v15, %v252_v10  ;;  %v1125_v10 = vld [vmem:[%s1363_s1 + $0xe] sm:$0x3]  ;;  %v1129_v12 = vld [vmem:[%s1363_s1 + $0x10] sm:$0x3]  ;;  %vm1002_vm3 = vcmask 11272  }
  0x9e   : > { %v384_v18 = vpop.permute.xlu1 %383  ;;  %v264_v19 = vsel %vm262_vm0, %v256_v16, 0 }
  0x9f   : > { %279 = vmatpush.bf16.msra.mxu0 %v264_v19  ;;  %v390_v20 = vsel %vm389_vm2, %v384_v18, %v386_v0  ;;  %v554_v31 = vpop.permute.xlu2 %553  ;;  %v1121_v0 = vld [vmem:[%s1363_s1 + $0xc] sm:$0x3]  ;;  %vm990_vm2 = vcmask 3072  }
  0xa0   : > { %v396_v22 = vsel %vm262_vm0, %v390_v20, 0 }
  0xa1   : > { %411 = vmatpush.bf16.msrb.mxu2 %v396_v22 }
  0xa2   : > { %1099 = vmatmul.msk.bf16.vlgmr.msra.gmra.mxu0 %vm258_vm1, %v1098_v11  ;;  %v332_v13 = vpop.f32.mrf.mxu3 }
  0xa3   : > { %343 = vmatpush.bf16.msrb.mxu0 %v318_v17 }
  0xa6   : > { %v472_v23 = vpop.permute.xlu1 %471  ;;  %v470_v24 = vpop.permute.xlu0 %469 }
  0xa7   : > { %437 = vmatpush.bf16.msra.mxu0 %v402_v21  ;;  %v486_v25 = vsel %vm262_vm0, %v472_v23, 0  ;;  %v474_v26 = vsel %vm473_vm4, %v468_v5, %v470_v24  ;;  %v475_v27 = vsel %vm473_vm4, %v470_v24, %v472_v23  ;;  %v720_v39 = vpop.permute.xlu2 %719 }
  0xa8   : > { %v480_v28 = vsel %vm262_vm0, %v474_v26, 0  ;;  %v483_v29 = vsel %vm262_vm0, %v475_v27, 0  ;;  %521 = vmatpush.bf16.msra.mxu3 %v486_v25 }
  0xa9   : > { %1106 = vmatmul.msk.bf16.vlgmr.msrb.gmra.mxu2 %vm258_vm1, %v1254_v8  ;;  %495 = vmatpush.bf16.msra.mxu1 %v480_v28 }
  0xaa   : > { %508 = vmatpush.bf16.msra.mxu2 %v483_v29  ;;  %v334_v14 = vpop.f32.mrf.mxu3 }
  0xab   : > { %1112 = vmatmul.msk.bf16.vlgmr.msra.gmra.mxu3 %vm258_vm1, %v1109_v30 }
  0xac   : > { %1104 = vmatmul.msk.bf16.vlgmr.msrb.gmra.mxu1 %vm258_vm1, %v1243_v63 }
  0xae   : > { %v552_v32 = vpop.permute.xlu1 %551  ;;  %v556_v33 = vpop.permute.xlu0 %555 }
  0xaf   : > { %v558_v34 = vsel %vm557_vm5, %v552_v32, %v554_v31  ;;  %v559_v35 = vsel %vm557_vm5, %v554_v31, %v556_v33  ;;  %v570_v36 = vsel %vm262_vm0, %v556_v33, 0  ;;  %v724_v45 = vpop.permute.xlu2 %723 }
  0xb0   : > { %v564_v37 = vsel %vm262_vm0, %v558_v34, 0  ;;  %v567_v38 = vsel %vm262_vm0, %v559_v35, 0  ;;  %605 = vmatpush.bf16.msrb.mxu2 %v570_v36  ;;  %v738_v1 = vsel %vm262_vm0, %v724_v45, 0 }
  0xb1   : > { %592 = vmatpush.bf16.msrb.mxu1 %v567_v38 }
  0xb2   : > { %1103 = vmatmul.msk.bf16.vlgmr.msrb.gmra.mxu0 %vm258_vm1, %v1243_v63 }
  0xb3   : > { %579 = vmatpush.bf16.msrb.mxu0 %v564_v37 }
  0xb6   : > { %v638_v40 = vpop.permute.xlu1 %637  ;;  %v636_v41 = vpop.permute.xlu0 %635 }
  0xb7   : > { %v642_v42 = vsel %vm641_vm6, %v636_v41, %v638_v40  ;;  %v804_v55 = vpop.permute.xlu2 %803 }
  0xb8   : > { %v648_v43 = vsel %vm262_vm0, %v642_v42, 0 }
  0xb9   : > { %1111 = vmatmul.msk.bf16.vlgmr.msra.gmra.mxu2 %vm258_vm1, %v1109_v30  ;;  %663 = vmatpush.bf16.msrb.mxu3 %v648_v43 }
  0xbc   : > { %1110 = vmatmul.msk.bf16.vlgmr.msra.gmra.mxu1 %vm258_vm1, %v1109_v30  ;;  %1118 = vmatmul.msk.bf16.vlgmr.msrb.gmra.mxu3 %vm258_vm1, %v1117_v44 }
  0xbe   : > { %v640_v46 = vpop.permute.xlu1 %639  ;;  %v722_v47 = vpop.permute.xlu0 %721 }
  0xbf   : > { %v643_v48 = vsel %vm641_vm6, %v638_v40, %v640_v46  ;;  %v654_v49 = vsel %vm262_vm0, %v640_v46, 0  ;;  %v726_v50 = vsel %vm725_vm7, %v720_v39, %v722_v47  ;;  %v727_v51 = vsel %vm725_vm7, %v722_v47, %v724_v45  ;;  %v890_v2 = vpop.permute.xlu2 %889 }
  0xc0   : > { %v651_v52 = vsel %vm262_vm0, %v643_v48, 0  ;;  %v732_v53 = vsel %vm262_vm0, %v726_v50, 0  ;;  %v735_v54 = vsel %vm262_vm0, %v727_v51, 0  ;;  %689 = vmatpush.bf16.msra.mxu1 %v654_v49 }
  0xc1   : > { %747 = vmatpush.bf16.msra.mxu2 %v732_v53  ;;  %760 = vmatpush.bf16.msra.mxu3 %v735_v54 }
  0xc2   : > { %1108 = vmatmul.msk.bf16.vlgmr.msra.gmra.mxu0 %vm258_vm1, %v1254_v8 }
  0xc3   : > { %676 = vmatpush.bf16.msra.mxu0 %v651_v52 }
  0xc6   : > { %v808_v57 = vpop.permute.xlu1 %807  ;;  %v806_v58 = vpop.permute.xlu0 %805 }
  0xc7   : > { %v822_v59 = vsel %vm262_vm0, %v808_v57, 0  ;;  %v810_v60 = vsel %vm809_vm8, %v804_v55, %v806_v58  ;;  %v811_v61 = vsel %vm809_vm8, %v806_v58, %v808_v57 }
  0xc8   : > { %v819_v62 = vsel %vm262_vm0, %v811_v61, 0  ;;  %857 = vmatpush.bf16.msrb.mxu3 %v822_v59  ;;  %v816_v63 = vsel %vm262_vm0, %v810_v60, 0 }
  0xc9   : > { %1116 = vmatmul.msk.bf16.vlgmr.msrb.gmra.mxu2 %vm258_vm1, %v1113_v56 }
  0xca   : > { %844 = vmatpush.bf16.msrb.mxu2 %v819_v62 }
  0xcc   : > { %1115 = vmatmul.msk.bf16.vlgmr.msrb.gmra.mxu1 %vm258_vm1, %v1113_v56  ;;  %1123 = vmatmul.msk.bf16.vlgmr.msra.gmra.mxu3 %vm258_vm1, %v1121_v0 }
  0xcd   : > { %831 = vmatpush.bf16.msrb.mxu1 %v816_v63 }
  0xce   : > { %v892_v4 = vpop.permute.xlu0 %891  ;;  %v888_v9 = vpop.permute.xlu1 %887 }
  0xcf   : > { %v895_v6 = vsel %vm893_vm9, %v890_v2, %v892_v4  ;;  %v906_v7 = vsel %vm262_vm0, %v892_v4, 0  ;;  %v894_v11 = vsel %vm893_vm9, %v888_v9, %v890_v2 }
  0xd0   : > { %v903_v8 = vsel %vm262_vm0, %v895_v6, 0  ;;  %v900_v3 = vsel %vm262_vm0, %v894_v11, 0 }
  0xd2   : > { %1114 = vmatmul.msk.bf16.vlgmr.msrb.gmra.mxu0 %vm258_vm1, %v1113_v56 }
  0xd3   : > { %773 = vmatpush.bf16.msrb.mxu0 %v738_v1 }
  0xd9   : > { %1122 = vmatmul.msk.bf16.vlgmr.msra.gmra.mxu2 %vm258_vm1, %v1121_v0 }
  0xda   : > { %941 = vmatpush.bf16.msra.mxu2 %v906_v7 }
  0xdc   : > { %1120 = vmatmul.msk.bf16.vlgmr.msra.gmra.mxu1 %vm258_vm1, %v1117_v44  ;;  %1128 = vmatmul.msk.bf16.vlgmr.msrb.gmra.mxu3 %vm258_vm1, %v1125_v10 }
  0xdd   : > { %928 = vmatpush.bf16.msra.mxu1 %v903_v8 }
  0xe2   : > { %1119 = vmatmul.msk.bf16.vlgmr.msra.gmra.mxu0 %vm258_vm1, %v1117_v44 }
  0xe3   : > { %915 = vmatpush.bf16.msra.mxu0 %v900_v3 }
  0xe9   : > { %1127 = vmatmul.msk.bf16.vlgmr.msrb.gmra.mxu2 %vm258_vm1, %v1125_v10 }
  0xec   : > { %1126 = vmatmul.msk.bf16.vlgmr.msrb.gmra.mxu1 %vm258_vm1, %v1125_v10 }
  0xf2   : > { %1124 = vmatmul.msk.bf16.vlgmr.msrb.gmra.mxu0 %vm258_vm1, %v1121_v0 }
  0xf9   : > { %1132 = vmatmul.msk.bf16.vlgmr.msra.gmra.mxu2 %vm258_vm1, %v1129_v12 }
  0xfc   : > { %1131 = vmatmul.msk.bf16.vlgmr.msra.gmra.mxu1 %vm258_vm1, %v1129_v12 }
 0x102   : > { %1130 = vmatmul.msk.bf16.vlgmr.msra.gmra.mxu0 %vm258_vm1, %v1129_v12  ;;  %vm980_vm1 = vmor %vm979_vm13, %vm978_vm14 }
 0x118   : > { %v426_v15 = vpop.f32.mrf.mxu3 }
 0x119   : > { %v294_v16 = vpop.f32.mrf.mxu1 }
 0x11c   : > { %v307_v17 = vpop.f32.mrf.mxu2 }
 0x11f   : > { %v281_v18 = vpop.f32.mrf.mxu0 }
 0x120   : > { %v333_v19 = vadd.f32 %v332_v13, %v281_v18  ;;  %v428_v20 = vpop.f32.mrf.mxu3  ;;  %v210_v13 = vld [vmem:[%s1364_s2] sm:$0x7] }
 0x121   : > { %v296_v21 = vpop.f32.mrf.mxu1  ;;  %v952_v18 = vperm.slane %v210_v13, 1  ;;  %v953_v20 = vperm.slane %v210_v13, 2 }
 0x124   : > { %v309_v22 = vpop.f32.mrf.mxu2 }
 0x127   : > { %v283_v5 = vpop.f32.mrf.mxu0 }
 0x129   : > { %v358_v23 = vpop.f32.mrf.mxu1 }
 0x12a   : > { %v359_v24 = vadd.f32 %v358_v23, %v307_v17 }
 0x12c   : > { %v413_v25 = vpop.f32.mrf.mxu2 }
 0x12d   : > { %v443_v26 = vadd.f32 %v413_v25, %v333_v19  ;;  %v951_v25 = vperm.slane %v210_v13, 0 }
 0x12e   : > { %v523_v27 = vpop.f32.mrf.mxu3 }
 0x12f   : > { %v345_v28 = vpop.f32.mrf.mxu0 }
 0x130   : > { %v346_v29 = vadd.f32 %v345_v28, %v294_v16 }
 0x131   : > { %v360_v30 = vpop.f32.mrf.mxu1 }
 0x132   : > { %v444_v31 = vadd.f32 %v426_v15, %v346_v29 }
 0x134   : > { %v415_v32 = vpop.f32.mrf.mxu2 }
 0x136   : > { %v525_v33 = vpop.f32.mrf.mxu3 }
 0x137   : > { %v347_v34 = vpop.f32.mrf.mxu0 }
 0x139   : > { %v497_v35 = vpop.f32.mrf.mxu1 }
 0x13a   : > { %v527_v7 = vadd.f32 %v497_v35, %v443_v26 }
 0x13c   : > { %v510_v36 = vpop.f32.mrf.mxu2 }
 0x13d   : > { %v528_v63 = vadd.f32 %v510_v36, %v444_v31 }
 0x13f   : > { %v439_v37 = vpop.f32.mrf.mxu0  ;;  %v665_v38 = vpop.f32.mrf.mxu3 }
 0x140   : > { %v445_v39 = vadd.f32 %v439_v37, %v359_v24 }
 0x141   : > { %v499_v40 = vpop.f32.mrf.mxu1 }
 0x142   : > { %v529_v41 = vadd.f32 %v523_v27, %v445_v39 }
 0x144   : > { %v512_v42 = vpop.f32.mrf.mxu2 }
 0x147   : > { %v441_v43 = vpop.f32.mrf.mxu0  ;;  %v667_v44 = vpop.f32.mrf.mxu3 }
 0x149   : > { %v594_v45 = vpop.f32.mrf.mxu1 }
 0x14a   : > { %v612_v1 = vadd.f32 %v594_v45, %v528_v63 }
 0x14c   : > { %v607_v46 = vpop.f32.mrf.mxu2 }
 0x14d   : > { %v613_v6 = vadd.f32 %v607_v46, %v529_v41 }
 0x14f   : > { %v581_v47 = vpop.f32.mrf.mxu0  ;;  %v762_v48 = vpop.f32.mrf.mxu3 }
 0x150   : > { %v611_v10 = vadd.f32 %v581_v47, %v527_v7 }
 0x151   : > { %v596_v49 = vpop.f32.mrf.mxu1 }
 0x152   : > { %v695_v16 = vadd.f32 %v665_v38, %v611_v10 }
 0x154   : > { %v609_v50 = vpop.f32.mrf.mxu2 }
 0x157   : > { %v583_v51 = vpop.f32.mrf.mxu0  ;;  %v764_v52 = vpop.f32.mrf.mxu3 }
 0x159   : > { %v691_v53 = vpop.f32.mrf.mxu1 }
 0x15a   : > { %v697_v9 = vadd.f32 %v691_v53, %v613_v6 }
 0x15c   : > { %v749_v54 = vpop.f32.mrf.mxu2 }
 0x15d   : > { %v779_v21 = vadd.f32 %v749_v54, %v695_v16 }
 0x15f   : > { %v678_v55 = vpop.f32.mrf.mxu0  ;;  %v859_v56 = vpop.f32.mrf.mxu3 }
 0x160   : > { %v696_v4 = vadd.f32 %v678_v55, %v612_v1 }
 0x161   : > { %v693_v57 = vpop.f32.mrf.mxu1 }
 0x162   : > { %v780_v11 = vadd.f32 %v762_v48, %v696_v4 }
 0x164   : > { %v751_v58 = vpop.f32.mrf.mxu2 }
 0x167   : > { %v680_v59 = vpop.f32.mrf.mxu0  ;;  %v861_v60 = vpop.f32.mrf.mxu3 }
 0x169   : > { %v833_v61 = vpop.f32.mrf.mxu1 }
 0x16a   : > { %v863_v23 = vadd.f32 %v833_v61, %v779_v21 }
 0x16c   : > { %v846_v62 = vpop.f32.mrf.mxu2 }
 0x16d   : > { %v864_v14 = vadd.f32 %v846_v62, %v780_v11 }
 0x16f   : > { %v775_v0 = vpop.f32.mrf.mxu0 }
 0x170   : > { %v781_v3 = vadd.f32 %v775_v0, %v697_v9 }
 0x171   : > { %v835_v2 = vpop.f32.mrf.mxu1 }
 0x172   : > { %v865_v19 = vadd.f32 %v859_v56, %v781_v3 }
 0x174   : > { %v848_v8 = vpop.f32.mrf.mxu2 }
 0x177   : > { %v777_v12 = vpop.f32.mrf.mxu0 }
 0x179   : > { %v930_v15 = vpop.f32.mrf.mxu1 }
 0x17a   : > { %v948_v17 = vadd.f32 %v930_v15, %v864_v14 }
 0x17c   : > { %v943_v22 = vpop.f32.mrf.mxu2  ;;  %v958_v24 = vmul.f32 %v952_v18, %v948_v17 }
 0x17d   : > { %v949_v5 = vadd.f32 %v943_v22, %v865_v19 }
 0x17e   : > { %v993_v32 = vmul.f32 %v958_v24, %v958_v24  ;;  %v983_v34 = vsel %vm974_vm10, %v958_v24, 0.0 }
 0x17f   : > { %v959_v26 = vmul.f32 %v953_v20, %v949_v5  ;;  %v917_v27 = vpop.f32.mrf.mxu0 }
 0x180   : > { %v947_v28 = vadd.f32 %v917_v27, %v863_v23  ;;  %v996_v45 = vsel %vm974_vm10, %v993_v32, 0.0 }
 0x181   : > { %v961_v29 = vpack.c.bf16 %v959_v26, %v959_v26  ;;  %v932_v30 = vpop.f32.mrf.mxu1  ;;  %v994_v35 = vmul.f32 %v959_v26, %v959_v26  ;;  %v986_v43 = vsel %vm985_vm12, %v959_v26, 0.0 }
 0x182   : > { %v957_v31 = vmul.f32 %v951_v25, %v947_v28 }
 0x183   : > { %v965_v33 = vrot.slane %v961_v29, 4  ;;  %v966_v36 = vrot.slane %v961_v29, 6  ;;  %v998_v51 = vsel %vm985_vm12, %v994_v35, 0.0 }
 0x184   : > { %v960_v37 = vpack.c.bf16 %v958_v24, %v957_v31  ;;  %v945_v38 = vpop.f32.mrf.mxu2  ;;  %v982_v39 = vsel %vm974_vm10, %v957_v31, 0.0  ;;  %v992_v40 = vmul.f32 %v957_v31, %v957_v31 }
 0x185   : > { %v984_v41 = vadd.f32 %v983_v34, %v982_v39  ;;  %v973_v49 = vsel %vm970_vm15, %v965_v33, %v966_v36 }
 0x186   : > { %v964_v42 = vrot.slane %v960_v37, 2  ;;  %v995_v44 = vsel %vm974_vm10, %v992_v40, 0.0 }
 0x187   : > { %v919_v46 = vpop.f32.mrf.mxu0  ;;  %v987_v47 = vadd.f32 %v986_v43, %v984_v41  ;;  %v997_v48 = vadd.f32 %v996_v45, %v995_v44 }
 0x188   : > { %v969_v50 = vsel %vm262_vm0, %v960_v37, %v964_v42 }
 0x189   : > { %988 = vadd.xlane.f32.xlu0 %v987_v47  ;;  %v975_v52 = vsel %vm974_vm10, %v969_v50, %v973_v49  ;;  %v999_v53 = vadd.f32 %v998_v51, %v997_v48 }
 0x18a   : > { %981 = vst.msk [vmem:[%s204_s28] sm:$0x3f] %vm980_vm1, %v975_v52 }
 0x18b   : > { %1000 = vadd.xlane.f32.xlu1 %v999_v53 }
 0x1fc   : > { %v989_v54 = vpop.xlane.xlu0 %988 }
 0x1fd   : > { %991 = vst.msk [vmem:[%s208_s6] sm:$0xf] %vm990_vm2, %v989_v54 }
 0x1fe   : > { %v1001_v55 = vpop.xlane.xlu1 %1000 }
 0x1ff   : > { %1003 = vst.msk [vmem:[%s208_s6] sm:$0xf] %vm1002_vm3, %v1001_v55 }
 0x200 PF: > { %s15_s15 = sadd.s32 1, %s1159_s15  }
 0x201   : > { %p12_p4 = scmp.ge.s32.totalorder %s15_s15, 4  }
 0x203   :  { %14 = sbr.rel (!%p12_p4) target bundleno = 1 (0x1), region = 91 }

// kernel: residual_block_forward.4
= control target key start
LH: loop header
LB: loop body
LE: loop exit
PB: predicated region body
PF: predicated region fallthrough
CT: control target
= control target key end

     0   :  { %s1321_s21 = smov 0   ;;  %s1487_s0 = inlined_call_operand.vmem [shape: bf16[2,4,288], index: 0, kind: input, shape index: {}]   ;;  %s1488_s1 = inlined_call_operand.vmem [shape: f32[4,1], index: 1, kind: input, shape index: {}]   ;;  %s1489_s2 = inlined_call_operand.vmem [shape: f32[4,1], index: 2, kind: input, shape index: {}]   ;;  %s1490_s3 = inlined_call_operand.vmem [shape: bf16[9,4,4], index: 3, kind: input, shape index: {}]   ;;  %s1491_s4 = inlined_call_operand.vmem [shape: f32[1,288], index: 4, kind: input, shape index: {}]   ;;  %s1492_s5 = inlined_call_operand.vmem [shape: bf16[2,4,288], index: 5, kind: output, shape index: {0}]   ;;  %s1493_s6 = inlined_call_operand.vmem [shape: f32[2,4,2], index: 6, kind: output, shape index: {1}]  }
   0x1 LB: > { %s1199_s22 = sadd.s32 4294967295, %s1272_s21   ;;  %p1203_p0 = scmp.ge.s32.totalorder %s1272_s21, 1  ;;  %s1272_s21 = sphi %s1321_s21, %s17_s21  }
   0x2   : > { %p215_p1 = scmp.lt.s32.totalorder %s1272_s21, 3 }
   0x4   : > { %p216_p2 = pnand %p1203_p0, %p215_p1 }
   0x5   : > { %p249_p3 = scmp.lt.s32.totalorder (!%p216_p2), %s1199_s22, 1  ;;  %s1277_s9 = smov (!%p216_p2), 19  }
   0x6   : > { %219 = sbr.rel (%p216_p2) target bundleno = 759 (0x2f7), region = 40  ;;  %s1278_s10 = smov (!%p216_p2), 127  }
   0x7   : > { %s1279_s11 = smov (!%p216_p2), 126   ;;  %s1280_s12 = smov (!%p216_p2), 110  }
   0x8   : > { %s1281_s13 = smov (!%p216_p2), 109   ;;  %s1282_s14 = smov (!%p216_p2), 108  }
   0x9   : > { %s1283_s15 = smov (!%p216_p2), 92   ;;  %s1284_s16 = smov (!%p216_p2), 91  }
   0xa   : > { %s1285_s17 = smov (!%p216_p2), 90  }
   0xb   : > { %v268_v0 = vld [vmem:[%s1488_s1] sm:$0xf]  ;;  %v1274_v1 = vmov 0   ;;  %s1495_s22 = smov (!%p249_p3, %s1199_s22), 1  ;;  %v1275_v3 = vmov 0.0   ;;  %vm302_vm0 = vcmask 1043456  }
   0xc   : > { %1265 = vset.pattern.permute.xlu0 %v1274_v1  ;;  %v280_v2 = vld [vmem:[%s1489_s2] sm:$0xf]  ;;  %307 = vst [vmem:[#allocation2] sm:$0xff] %v1275_v3  ;;  %s1244_s27 = smul.u32 6, %s1495_s22  ;;  %v1276_v4 = vmov 839922192  }
   0xd   : > { %271 = vperm.xlu0 %1265, %v268_v0   ;;  %v274_v5 = vunpack.c.l.s4 %v1276_v4  ;;  %v1346_v8 = vld [vmem:[%s1491_s4] sm:$0x7]  ;;  %vm308_vm1 = vcmask 568320   ;;  %vm322_vm2 = vcmask 1043608   ;;  %vm323_vm3 = vcmask 1047556  }
   0xe   : > { %s253_s30 = scalar_lea.vmem %s1487_s0, %s1244_s27  ;;  %v296_v10 = vperm.slane %v1346_v8, 1  ;;  %v295_v14 = vperm.slane %v1346_v8, 0  ;;  %v297_v26 = vperm.slane %v1346_v8, 2  ;;  %309 = vst.msk [vmem:[#allocation2 + $0x8] sm:$0xf] %vm308_vm1, %v1275_v3  ;;  %vm317_vm4 = vcmask 154624   ;;  %vm324_vm5 = vmor %vm323_vm3, %vm322_vm2 }
   0xf   : > { %v275_v7 = vunpack.c.0.s8 %v274_v5  ;;  %v265_v9 = vld [vmem:[%s253_s30] sm:$0x3f]  ;;  %vm326_vm6 = vcmask 412672   ;;  %vm379_vm7 = vcmask 1041408   ;;  %vm375_vm8 = vcmask 31744  }
  0x10   : > { %v266_v11 = vunpack.c.l.bf16 %v265_v9  ;;  %v301_v15 = vrot.slane %v296_v10, 4  ;;  %v267_v16 = vunpack.c.h.bf16 %v265_v9  ;;  %vm372_vm9 = vcmask 1039360  }
  0x11   : > { %vm506_vm10 = vcmask 1031168   ;;  %vm590_vm11 = vcmask 900096   ;;  %vm674_vm12 = vcmask 891904   ;;  %vm758_vm13 = vcmask 883712  }
  0x12   : > { %v303_v20 = vsel %vm302_vm0, %v295_v14, %v301_v15  ;;  %vm842_vm14 = vcmask 752640   ;;  %vm926_vm15 = vcmask 744448   ;;  %vm1010_vm1 = vcmask 736256  }
  0x13   : > { %vm1086_vm2 = vcmask 1043458   ;;  %vm1080_vm3 = vcmask 1045508  }
  0x15   : > { %283 = vperm.xlu0 %1265, %v280_v2  }
  0x7f   : > { %v272_v6 = vpop.permute.xlu0 %271 }
  0x80   : > { %v276_v12 = vperm.slane %v272_v6, %v275_v7 }
  0x82   : > { %v278_v17 = vmul.f32 %v276_v12, %v266_v11  ;;  %v279_v21 = vmul.f32 %v276_v12, %v267_v16 }
  0x87   : > { %v284_v13 = vpop.permute.xlu0 %283 }
  0x88   : > { %v288_v18 = vperm.slane %v284_v13, %v275_v7 }
  0x8a   : > { %v290_v19 = vadd.f32 %v288_v18, %v278_v17  ;;  %v291_v23 = vadd.f32 %v288_v18, %v279_v21 }
  0x8c   : > { %v292_v22 = vmax.f32 %v290_v19, 0.0  ;;  %v293_v25 = vmax.f32 %v291_v23, 0.0 }
  0x8e   : > { %v305_v24 = vmul.f32 %v303_v20, %v292_v22  ;;  %v306_v27 = vmul.f32 %v297_v26, %v293_v25 }
  0x90   : > { %312 = vrot.lane.b32.xlu1 %v305_v24, %s1277_s9 }
  0x98   : > { %314 = vrot.lane.b32.xlu1 %v306_v27, %s1277_s9 }
 0x102   : > { %v313_v28 = vpop.permute.xlu1 %312 }
 0x103   : > { %v316_v29 = vrot.slane %v313_v28, 4 }
 0x105   : > { %v318_v30 = vsel %vm317_vm4, %v316_v29, %v313_v28 }
 0x106   : > { %325 = vst.msk [vmem:[#allocation2] sm:$0xff] %vm324_vm5, %v318_v30  ;;  %vm1094_vm5 = vcmask 257024  }
 0x10a   : > { %v315_v31 = vpop.permute.xlu1 %314 }
 0x10b   : > { %v319_v32 = vsel %vm317_vm4, %v316_v29, %v315_v31  ;;  %vm1088_vm4 = vcmask 259076  }
 0x10c   : > { %327 = vst.msk [vmem:[#allocation2 + $0x8] sm:$0xf] %vm326_vm6, %v319_v32  ;;  %vm1087_vm6 = vmor %vm1086_vm2, %vm379_vm7 }
 0x10d   : > { %v1358_v33 = vld [vmem:[#allocation2] sm:$0xff] }
 0x10e   : > { %332 = vst [vmem:[#allocation1] ss:$2 sm:$0xff] %v1358_v33 }
 0x113   : > { %v329_v34 = vld [vmem:[#allocation2 + $0x8] sm:$0xf] }
 0x114   : > { %334 = vst [vmem:[#allocation1 + $0x10] ss:$2 sm:$0xff] %v329_v34  ;;  %v346_v39 = vld [vmem:[#allocation2 + $0x8] sm:$0xf] }
 0x115   : > { %v335_v35 = vld.sshfl [vmem:[#allocation1] sm:$0xff pattern:$0x75316420]  ;;  %v1361_v36 = vld.sshfl [vmem:[#allocation1 + $0x8] sm:$0xff pattern:$0x75316420] }
 0x116   : > { %v341_v37 = vpack.c.bf16 %v335_v35, %v335_v35  ;;  %349 = vst [vmem:[#allocation1] ss:$2 sm:$0xff] %v1358_v33  ;;  %v480_v44 = vld [vmem:[#allocation2 + $0x8] sm:$0xf] }
 0x117   : > { %v564_v51 = vld [vmem:[#allocation2 + $0x8] sm:$0xf] }
 0x118   : > { %v432_v38 = vsel %vm379_vm7, %v341_v37, 0  ;;  %v648_v57 = vld [vmem:[#allocation2 + $0x8] sm:$0xf]  ;;  %v344_v37 = vld [vmem:[%s1490_s3] sm:$0x3] }
 0x119   : > { %447 = vmatpush.bf16.msra.mxu3 %v432_v38  ;;  %v732_v0 = vld [vmem:[#allocation2 + $0x8] sm:$0xf] }
 0x11a   : > { %v816_v6 = vld [vmem:[#allocation2 + $0x8] sm:$0xf] }
 0x11b   : > { %v1365_v40 = vld.sshfl [vmem:[#allocation1 + $0x10] sm:$0xff pattern:$0x75316420] }
 0x11c   : > { %351 = vst [vmem:[#allocation1 + $0x10] ss:$2 sm:$0xff] %v346_v39  ;;  %v900_v16 = vld [vmem:[#allocation2 + $0x8] sm:$0xf]  ;;  %1211 = vmatmul.msk.bf16.vlgmr.msra.gmra.mxu3 %vm375_vm8, %v344_v37 }
 0x11d   : > { %v353_v41 = vld.sshfl [vmem:[#allocation1 + $0x8] sm:$0xff pattern:$0x75316420]  ;;  %v352_v42 = vld.sshfl [vmem:[#allocation1] sm:$0xff pattern:$0x75316420] }
 0x11e   : > { %v359_v43 = vpack.c.bf16 %v353_v41, %v353_v41  ;;  %483 = vst [vmem:[#allocation1] ss:$2 sm:$0xff] %v1358_v33  ;;  %v358_v53 = vpack.c.bf16 %v352_v42, %v352_v42  ;;  %v984_v23 = vld [vmem:[#allocation2 + $0x8] sm:$0xf]  ;;  %v1207_v41 = vld [vmem:[%s1490_s3 + $0x2] sm:$0x3] }
 0x120   : > { %368 = vrot.lane.b32.xlu0 %v359_v43, %s1278_s10 }
 0x123   : > { %v354_v45 = vld.sshfl [vmem:[#allocation1 + $0x10] sm:$0xff pattern:$0x75316420] }
 0x124   : > { %v360_v46 = vpack.c.bf16 %v354_v45, %v354_v45  ;;  %485 = vst [vmem:[#allocation1 + $0x10] ss:$2 sm:$0xff] %v480_v44  ;;  %v342_v44 = vpack.c.bf16 %v1361_v36, %v1361_v36  ;;  %v343_v45 = vpack.c.bf16 %v1365_v40, %v1365_v40 }
 0x125   : > { %v486_v47 = vld.sshfl [vmem:[#allocation1] sm:$0xff pattern:$0x75316420]  ;;  %v487_v48 = vld.sshfl [vmem:[#allocation1 + $0x8] sm:$0xff pattern:$0x75316420] }
 0x126   : > { %370 = vrot.lane.b32.xlu2 %v360_v46, %s1278_s10  ;;  %v492_v49 = vpack.c.bf16 %v486_v47, %v486_v47  ;;  %567 = vst [vmem:[#allocation1] ss:$2 sm:$0xff] %v1358_v33  ;;  %v493_v60 = vpack.c.bf16 %v487_v48, %v487_v48 }
 0x128   : > { %500 = vrot.lane.b32.xlu1 %v492_v49, %s1279_s11 }
 0x12b   : > { %v488_v50 = vld.sshfl [vmem:[#allocation1 + $0x10] sm:$0xff pattern:$0x75316420] }
 0x12c   : > { %v494_v52 = vpack.c.bf16 %v488_v50, %v488_v50  ;;  %569 = vst [vmem:[#allocation1 + $0x10] ss:$2 sm:$0xff] %v564_v51  ;;  %v435_v51 = vsel %vm379_vm7, %v342_v44, 0  ;;  %v1230_v44 = vld [vmem:[%s1490_s3 + $0xc] sm:$0x3] }
 0x12d   : > { %v571_v54 = vld.sshfl [vmem:[#allocation1 + $0x8] sm:$0xff pattern:$0x75316420]  ;;  %v570_v55 = vld.sshfl [vmem:[#allocation1] sm:$0xff pattern:$0x75316420] }
 0x12e   : > { %504 = vrot.lane.b32.xlu0 %v494_v52, %s1279_s11  ;;  %366 = vrot.lane.b32.xlu2 %v358_v53, %s1278_s10  ;;  %v577_v56 = vpack.c.bf16 %v571_v54, %v571_v54  ;;  %651 = vst [vmem:[#allocation1] ss:$2 sm:$0xff] %v1358_v33  ;;  %v576_v59 = vpack.c.bf16 %v570_v55, %v570_v55  ;;  %v438_v52 = vsel %vm379_vm7, %v343_v45, 0  ;;  %v1214_v55 = vld [vmem:[%s1490_s3 + $0x4] sm:$0x3] }
 0x130   : > { %586 = vrot.lane.b32.xlu1 %v577_v56, %s1280_s12 }
 0x133   : > { %v572_v58 = vld.sshfl [vmem:[#allocation1 + $0x10] sm:$0xff pattern:$0x75316420] }
 0x134   : > { %653 = vst [vmem:[#allocation1 + $0x10] ss:$2 sm:$0xff] %v648_v57  ;;  %v578_v3 = vpack.c.bf16 %v572_v58, %v572_v58 }
 0x135   : > { %v654_v61 = vld.sshfl [vmem:[#allocation1] sm:$0xff pattern:$0x75316420]  ;;  %v655_v62 = vld.sshfl [vmem:[#allocation1 + $0x8] sm:$0xff pattern:$0x75316420] }
 0x136   : > { %584 = vrot.lane.b32.xlu0 %v576_v59, %s1280_s12  ;;  %502 = vrot.lane.b32.xlu2 %v493_v60, %s1279_s11  ;;  %735 = vst [vmem:[#allocation1] ss:$2 sm:$0xff] %v1358_v33  ;;  %v661_v2 = vpack.c.bf16 %v655_v62, %v655_v62  ;;  %v660_v11 = vpack.c.bf16 %v654_v61, %v654_v61 }
 0x13b   : > { %v656_v63 = vld.sshfl [vmem:[#allocation1 + $0x10] sm:$0xff pattern:$0x75316420] }
 0x13c   : > { %v662_v1 = vpack.c.bf16 %v656_v63, %v656_v63  ;;  %737 = vst [vmem:[#allocation1 + $0x10] ss:$2 sm:$0xff] %v732_v0 }
 0x13d   : > { %v738_v4 = vld.sshfl [vmem:[#allocation1] sm:$0xff pattern:$0x75316420]  ;;  %v739_v5 = vld.sshfl [vmem:[#allocation1 + $0x8] sm:$0xff pattern:$0x75316420] }
 0x13e   : > { %672 = vrot.lane.b32.xlu1 %v662_v1, %s1281_s13  ;;  %670 = vrot.lane.b32.xlu0 %v661_v2, %s1281_s13  ;;  %819 = vst [vmem:[#allocation1] ss:$2 sm:$0xff] %v1358_v33  ;;  %v744_v9 = vpack.c.bf16 %v738_v4, %v738_v4  ;;  %v745_v19 = vpack.c.bf16 %v739_v5, %v739_v5  ;;  %v1218_v5 = vld [vmem:[%s1490_s3 + $0x6] sm:$0x3] }
 0x13f   : > { %588 = vrot.lane.b32.xlu2 %v578_v3, %s1280_s12 }
 0x143   : > { %v740_v7 = vld.sshfl [vmem:[#allocation1 + $0x10] sm:$0xff pattern:$0x75316420] }
 0x144   : > { %821 = vst [vmem:[#allocation1 + $0x10] ss:$2 sm:$0xff] %v816_v6  ;;  %v746_v27 = vpack.c.bf16 %v740_v7, %v740_v7 }
 0x145   : > { %v822_v12 = vld.sshfl [vmem:[#allocation1] sm:$0xff pattern:$0x75316420]  ;;  %v823_v13 = vld.sshfl [vmem:[#allocation1 + $0x8] sm:$0xff pattern:$0x75316420] }
 0x146   : > { %752 = vrot.lane.b32.xlu1 %v744_v9, %s1282_s14  ;;  %v828_v15 = vpack.c.bf16 %v822_v12, %v822_v12  ;;  %903 = vst [vmem:[#allocation1] ss:$2 sm:$0xff] %v1358_v33  ;;  %v829_v18 = vpack.c.bf16 %v823_v13, %v823_v13 }
 0x147   : > { %668 = vrot.lane.b32.xlu2 %v660_v11, %s1281_s13 }
 0x148   : > { %836 = vrot.lane.b32.xlu0 %v828_v15, %s1283_s15 }
 0x14b   : > { %v824_v17 = vld.sshfl [vmem:[#allocation1 + $0x10] sm:$0xff pattern:$0x75316420] }
 0x14c   : > { %905 = vst [vmem:[#allocation1 + $0x10] ss:$2 sm:$0xff] %v900_v16  ;;  %v830_v22 = vpack.c.bf16 %v824_v17, %v824_v17 }
 0x14d   : > { %v907_v20 = vld.sshfl [vmem:[#allocation1 + $0x8] sm:$0xff pattern:$0x75316420]  ;;  %v906_v21 = vld.sshfl [vmem:[#allocation1] sm:$0xff pattern:$0x75316420] }
 0x14e   : > { %838 = vrot.lane.b32.xlu1 %v829_v18, %s1283_s15  ;;  %987 = vst [vmem:[#allocation1] ss:$2 sm:$0xff] %v1358_v33  ;;  %v913_v25 = vpack.c.bf16 %v907_v20, %v907_v20  ;;  %v912_v28 = vpack.c.bf16 %v906_v21, %v906_v21 }
 0x14f   : > { %754 = vrot.lane.b32.xlu2 %v745_v19, %s1282_s14 }
 0x150   : > { %840 = vrot.lane.b32.xlu0 %v830_v22, %s1283_s15 }
 0x153   : > { %v908_v24 = vld.sshfl [vmem:[#allocation1 + $0x10] sm:$0xff pattern:$0x75316420] }
 0x154   : > { %989 = vst [vmem:[#allocation1 + $0x10] ss:$2 sm:$0xff] %v984_v23  ;;  %v914_v32 = vpack.c.bf16 %v908_v24, %v908_v24  ;;  %v1222_v24 = vld [vmem:[%s1490_s3 + $0x8] sm:$0x3] }
 0x155   : > { %v991_v31 = vld.sshfl [vmem:[#allocation1 + $0x8] sm:$0xff pattern:$0x75316420]  ;;  %v990_v33 = vld.sshfl [vmem:[#allocation1] sm:$0xff pattern:$0x75316420] }
 0x156   : > { %922 = vrot.lane.b32.xlu1 %v913_v25, %s1284_s16  ;;  %v997_v34 = vpack.c.bf16 %v991_v31, %v991_v31  ;;  %v996_v35 = vpack.c.bf16 %v990_v33, %v990_v33 }
 0x157   : > { %756 = vrot.lane.b32.xlu2 %v746_v27, %s1282_s14 }
 0x158   : > { %920 = vrot.lane.b32.xlu0 %v912_v28, %s1284_s16 }
 0x15b   : > { %v992_v29 = vld.sshfl [vmem:[#allocation1 + $0x10] sm:$0xff pattern:$0x75316420] }
 0x15c   : > { %v998_v30 = vpack.c.bf16 %v992_v29, %v992_v29 }
 0x15e   : > { %1008 = vrot.lane.b32.xlu1 %v998_v30, %s1285_s17 }
 0x15f   : > { %924 = vrot.lane.b32.xlu2 %v914_v32, %s1284_s16  ;;  %v1226_v32 = vld [vmem:[%s1490_s3 + $0xa] sm:$0x3] }
 0x160   : > { %1006 = vrot.lane.b32.xlu0 %v997_v34, %s1285_s17 }
 0x167   : > { %1004 = vrot.lane.b32.xlu2 %v996_v35, %s1285_s17  ;;  %s258_s17 = scalar_lea.vmem %s1492_s5, %s1244_s27  ;;  %s1206_s27 = sshll.u32 %s1495_s22, 2 }
 0x168   : > { %s262_s20 = scalar_lea.vmem %s1493_s6, %s1206_s27 }
 0x180   : > { %v371_v38 = vpop.permute.xlu2 %370 }
 0x181   : > { %v387_v39 = vsel %vm379_vm7, %v371_v38, 0 }
 0x182   : > { %422 = vmatpush.bf16.msra.mxu2 %v387_v39 }
 0x185   : > { %1210 = vmatmul.msk.bf16.vlgmr.msra.gmra.mxu2 %vm375_vm8, %v1207_v41 }
 0x188   : > { %v367_v42 = vpop.permute.xlu2 %366 }
 0x190   : > { %v503_v43 = vpop.permute.xlu2 %502 }
 0x192   : > { %v369_v46 = vpop.permute.xlu0 %368 }
 0x193   : > { %v373_v47 = vsel %vm372_vm9, %v367_v42, %v369_v46  ;;  %v374_v48 = vsel %vm372_vm9, %v369_v46, %v371_v38  ;;  %vm1099_vm9 = vcmask 3072  }
 0x194   : > { %v381_v49 = vsel %vm379_vm7, %v373_v47, 0  ;;  %v384_v50 = vsel %vm379_vm7, %v374_v48, 0 }
 0x195   : > { %396 = vmatpush.bf16.msra.mxu0 %v381_v49  ;;  %409 = vmatpush.bf16.msra.mxu1 %v384_v50 }
 0x198   : > { %1208 = vmatmul.msk.bf16.vlgmr.msra.gmra.mxu0 %vm375_vm8, %v1207_v41  ;;  %1209 = vmatmul.msk.bf16.vlgmr.msra.gmra.mxu1 %vm375_vm8, %v1207_v41 }
 0x199   : > { %460 = vmatpush.bf16.msrb.mxu0 %v435_v51  ;;  %473 = vmatpush.bf16.msrb.mxu1 %v438_v52  ;;  %v589_v36 = vpop.permute.xlu2 %588 }
 0x19a   : > { %v501_v40 = vpop.permute.xlu1 %500  ;;  %v603_v61 = vsel %vm379_vm7, %v589_v36, 0 }
 0x19b   : > { %v507_v53 = vsel %vm506_vm10, %v501_v40, %v503_v43  ;;  %v1238_v40 = vld [vmem:[%s1490_s3 + $0x10] sm:$0x3] }
 0x19c   : > { %v513_v54 = vsel %vm379_vm7, %v507_v53, 0 }
 0x19d   : > { %528 = vmatpush.bf16.msrb.mxu2 %v513_v54 }
 0x19f   : > { %v449_v53 = vpop.f32.mrf.mxu3 }
 0x1a0   : > { %v505_v56 = vpop.permute.xlu0 %504  ;;  %1215 = vmatmul.msk.bf16.vlgmr.msrb.gmra.mxu2 %vm375_vm8, %v1214_v55 }
 0x1a1   : > { %v519_v57 = vsel %vm379_vm7, %v505_v56, 0  ;;  %v669_v58 = vpop.permute.xlu2 %668  ;;  %v508_v59 = vsel %vm506_vm10, %v503_v43, %v505_v56  ;;  %vm1111_vm10 = vcmask 11272  }
 0x1a2   : > { %554 = vmatpush.bf16.msra.mxu0 %v519_v57  ;;  %v516_v60 = vsel %vm379_vm7, %v508_v59, 0  ;;  %v587_v62 = vpop.permute.xlu1 %586 }
 0x1a3   : > { %541 = vmatpush.bf16.msrb.mxu3 %v516_v60  ;;  %v592_v63 = vsel %vm590_vm11, %v587_v62, %v589_v36  ;;  %v1234_v36 = vld [vmem:[%s1490_s3 + $0xe] sm:$0x3] }
 0x1a4   : > { %v600_v0 = vsel %vm379_vm7, %v592_v63, 0 }
 0x1a5   : > { %625 = vmatpush.bf16.msra.mxu2 %v600_v0 }
 0x1a6   : > { %1216 = vmatmul.msk.bf16.vlgmr.msrb.gmra.mxu3 %vm375_vm8, %v1214_v55 }
 0x1a7   : > { %638 = vmatpush.bf16.msra.mxu3 %v603_v61  ;;  %v451_v54 = vpop.f32.mrf.mxu3 }
 0x1a8   : > { %v585_v1 = vpop.permute.xlu0 %584  ;;  %1212 = vmatmul.msk.bf16.vlgmr.msrb.gmra.mxu0 %vm375_vm8, %v344_v37  ;;  %1213 = vmatmul.msk.bf16.vlgmr.msrb.gmra.mxu1 %vm375_vm8, %v344_v37 }
 0x1a9   : > { %v591_v2 = vsel %vm590_vm11, %v585_v1, %v587_v62  ;;  %v755_v3 = vpop.permute.xlu2 %754 }
 0x1aa   : > { %v597_v4 = vsel %vm379_vm7, %v591_v2, 0 }
 0x1ab   : > { %612 = vmatpush.bf16.msra.mxu1 %v597_v4 }
 0x1b0   : > { %v671_v6 = vpop.permute.xlu0 %670  ;;  %v673_v7 = vpop.permute.xlu1 %672  ;;  %1220 = vmatmul.msk.bf16.vlgmr.msra.gmra.mxu2 %vm375_vm8, %v1218_v5 }
 0x1b1   : > { %v675_v9 = vsel %vm674_vm12, %v669_v58, %v671_v6  ;;  %v676_v11 = vsel %vm674_vm12, %v671_v6, %v673_v7  ;;  %v687_v12 = vsel %vm379_vm7, %v673_v7, 0  ;;  %v757_v16 = vpop.permute.xlu2 %756 }
 0x1b2   : > { %v681_v13 = vsel %vm379_vm7, %v675_v9, 0  ;;  %v684_v15 = vsel %vm379_vm7, %v676_v11, 0  ;;  %722 = vmatpush.bf16.msrb.mxu2 %v687_v12  ;;  %v760_v17 = vsel %vm758_vm13, %v755_v3, %v757_v16  ;;  %v771_v20 = vsel %vm379_vm7, %v757_v16, 0 }
 0x1b3   : > { %696 = vmatpush.bf16.msrb.mxu0 %v681_v13  ;;  %709 = vmatpush.bf16.msrb.mxu1 %v684_v15  ;;  %v768_v19 = vsel %vm379_vm7, %v760_v17, 0 }
 0x1b6   : > { %1221 = vmatmul.msk.bf16.vlgmr.msra.gmra.mxu3 %vm375_vm8, %v1218_v5 }
 0x1b8   : > { %v753_v18 = vpop.permute.xlu1 %752  ;;  %1217 = vmatmul.msk.bf16.vlgmr.msra.gmra.mxu0 %vm375_vm8, %v1214_v55  ;;  %1219 = vmatmul.msk.bf16.vlgmr.msra.gmra.mxu1 %vm375_vm8, %v1218_v5 }
 0x1b9   : > { %v759_v21 = vsel %vm758_vm13, %v753_v18, %v755_v3  ;;  %793 = vmatpush.bf16.msra.mxu0 %v768_v19  ;;  %806 = vmatpush.bf16.msra.mxu1 %v771_v20  ;;  %v925_v30 = vpop.permute.xlu2 %924 }
 0x1ba   : > { %v765_v22 = vsel %vm379_vm7, %v759_v21, 0  ;;  %v837_v23 = vpop.permute.xlu0 %836  ;;  %v939_v33 = vsel %vm379_vm7, %v925_v30, 0 }
 0x1bb   : > { %780 = vmatpush.bf16.msrb.mxu3 %v765_v22 }
 0x1c0   : > { %v839_v25 = vpop.permute.xlu1 %838  ;;  %1225 = vmatmul.msk.bf16.vlgmr.msrb.gmra.mxu2 %vm375_vm8, %v1222_v24 }
 0x1c1   : > { %v843_v27 = vsel %vm842_vm14, %v837_v23, %v839_v25  ;;  %v1005_v48 = vpop.permute.xlu2 %1004 }
 0x1c2   : > { %v849_v28 = vsel %vm379_vm7, %v843_v27, 0  ;;  %v841_v29 = vpop.permute.xlu0 %840 }
 0x1c3   : > { %864 = vmatpush.bf16.msra.mxu2 %v849_v28  ;;  %v844_v31 = vsel %vm842_vm14, %v839_v25, %v841_v29  ;;  %v855_v37 = vsel %vm379_vm7, %v841_v29, 0 }
 0x1c4   : > { %v852_v34 = vsel %vm379_vm7, %v844_v31, 0 }
 0x1c5   : > { %877 = vmatpush.bf16.msra.mxu3 %v852_v34 }
 0x1c6   : > { %1227 = vmatmul.msk.bf16.vlgmr.msrb.gmra.mxu3 %vm375_vm8, %v1226_v32 }
 0x1c8   : > { %v923_v35 = vpop.permute.xlu1 %922  ;;  %1223 = vmatmul.msk.bf16.vlgmr.msrb.gmra.mxu0 %vm375_vm8, %v1222_v24  ;;  %1224 = vmatmul.msk.bf16.vlgmr.msrb.gmra.mxu1 %vm375_vm8, %v1222_v24 }
 0x1c9   : > { %974 = vmatpush.bf16.msrb.mxu3 %v939_v33  ;;  %v928_v38 = vsel %vm926_vm15, %v923_v35, %v925_v30  ;;  %890 = vmatpush.bf16.msrb.mxu0 %v855_v37 }
 0x1ca   : > { %v936_v39 = vsel %vm379_vm7, %v928_v38, 0  ;;  %v921_v41 = vpop.permute.xlu0 %920 }
 0x1cb   : > { %961 = vmatpush.bf16.msrb.mxu2 %v936_v39  ;;  %v927_v42 = vsel %vm926_vm15, %v921_v41, %v923_v35 }
 0x1cc   : > { %v933_v43 = vsel %vm379_vm7, %v927_v42, 0 }
 0x1cd   : > { %948 = vmatpush.bf16.msrb.mxu1 %v933_v43 }
 0x1d0   : > { %v1009_v45 = vpop.permute.xlu1 %1008  ;;  %1231 = vmatmul.msk.bf16.vlgmr.msra.gmra.mxu2 %vm375_vm8, %v1230_v44 }
 0x1d1   : > { %v1023_v46 = vsel %vm379_vm7, %v1009_v45, 0 }
 0x1d2   : > { %1058 = vmatpush.bf16.msra.mxu2 %v1023_v46  ;;  %v1007_v47 = vpop.permute.xlu0 %1006 }
 0x1d3   : > { %v1011_v49 = vsel %vm1010_vm1, %v1005_v48, %v1007_v47  ;;  %v1012_v50 = vsel %vm1010_vm1, %v1007_v47, %v1009_v45 }
 0x1d4   : > { %v1017_v51 = vsel %vm379_vm7, %v1011_v49, 0  ;;  %v1020_v52 = vsel %vm379_vm7, %v1012_v50, 0 }
 0x1d6   : > { %1232 = vmatmul.msk.bf16.vlgmr.msra.gmra.mxu3 %vm375_vm8, %v1230_v44 }
 0x1d8   : > { %1228 = vmatmul.msk.bf16.vlgmr.msra.gmra.mxu0 %vm375_vm8, %v1226_v32  ;;  %1229 = vmatmul.msk.bf16.vlgmr.msra.gmra.mxu1 %vm375_vm8, %v1226_v32 }
 0x1d9   : > { %1032 = vmatpush.bf16.msra.mxu0 %v1017_v51  ;;  %1045 = vmatpush.bf16.msra.mxu1 %v1020_v52 }
 0x1e0   : > { %1236 = vmatmul.msk.bf16.vlgmr.msrb.gmra.mxu2 %vm375_vm8, %v1234_v36 }
 0x1e6   : > { %1237 = vmatmul.msk.bf16.vlgmr.msrb.gmra.mxu3 %vm375_vm8, %v1234_v36 }
 0x1e8   : > { %1233 = vmatmul.msk.bf16.vlgmr.msrb.gmra.mxu0 %vm375_vm8, %v1230_v44  ;;  %1235 = vmatmul.msk.bf16.vlgmr.msrb.gmra.mxu1 %vm375_vm8, %v1234_v36 }
 0x1f0   : > { %1241 = vmatmul.msk.bf16.vlgmr.msra.gmra.mxu2 %vm375_vm8, %v1238_v40 }
 0x1f8   : > { %1239 = vmatmul.msk.bf16.vlgmr.msra.gmra.mxu0 %vm375_vm8, %v1238_v40  ;;  %1240 = vmatmul.msk.bf16.vlgmr.msra.gmra.mxu1 %vm375_vm8, %v1238_v40  ;;  %vm1089_vm8 = vmor %vm1088_vm4, %vm1087_vm6 }
 0x208   : > { %v424_v55 = vpop.f32.mrf.mxu2 }
 0x210   : > { %v426_v56 = vpop.f32.mrf.mxu2 }
 0x215   : > { %v398_v57 = vpop.f32.mrf.mxu0  ;;  %v411_v58 = vpop.f32.mrf.mxu1 }
 0x216   : > { %v450_v59 = vadd.f32 %v449_v53, %v398_v57 }
 0x21d   : > { %v400_v60 = vpop.f32.mrf.mxu0  ;;  %v413_v61 = vpop.f32.mrf.mxu1 }
 0x223   : > { %v530_v62 = vpop.f32.mrf.mxu2 }
 0x224   : > { %v560_v63 = vadd.f32 %v530_v62, %v450_v59 }
 0x225   : > { %v462_v0 = vpop.f32.mrf.mxu0  ;;  %v475_v1 = vpop.f32.mrf.mxu1 }
 0x226   : > { %v463_v2 = vadd.f32 %v462_v0, %v411_v58  ;;  %v476_v3 = vadd.f32 %v475_v1, %v424_v55 }
 0x229   : > { %v543_v4 = vpop.f32.mrf.mxu3 }
 0x22a   : > { %v561_v5 = vadd.f32 %v543_v4, %v463_v2 }
 0x22b   : > { %v532_v6 = vpop.f32.mrf.mxu2 }
 0x22d   : > { %v464_v7 = vpop.f32.mrf.mxu0  ;;  %v477_v9 = vpop.f32.mrf.mxu1 }
 0x231   : > { %v545_v11 = vpop.f32.mrf.mxu3 }
 0x233   : > { %v627_v12 = vpop.f32.mrf.mxu2 }
 0x234   : > { %v645_v47 = vadd.f32 %v627_v12, %v561_v5 }
 0x235   : > { %v556_v13 = vpop.f32.mrf.mxu0  ;;  %v614_v15 = vpop.f32.mrf.mxu1 }
 0x236   : > { %v562_v43 = vadd.f32 %v556_v13, %v476_v3  ;;  %v644_v48 = vadd.f32 %v614_v15, %v560_v63 }
 0x239   : > { %v640_v16 = vpop.f32.mrf.mxu3 }
 0x23a   : > { %v646_v45 = vadd.f32 %v640_v16, %v562_v43 }
 0x23b   : > { %v629_v17 = vpop.f32.mrf.mxu2 }
 0x23d   : > { %v558_v18 = vpop.f32.mrf.mxu0  ;;  %v616_v19 = vpop.f32.mrf.mxu1 }
 0x241   : > { %v642_v20 = vpop.f32.mrf.mxu3 }
 0x243   : > { %v724_v21 = vpop.f32.mrf.mxu2 }
 0x244   : > { %v730_v49 = vadd.f32 %v724_v21, %v646_v45 }
 0x245   : > { %v698_v22 = vpop.f32.mrf.mxu0  ;;  %v711_v23 = vpop.f32.mrf.mxu1 }
 0x246   : > { %v728_v52 = vadd.f32 %v698_v22, %v644_v48  ;;  %v729_v36 = vadd.f32 %v711_v23, %v645_v47 }
 0x249   : > { %v782_v24 = vpop.f32.mrf.mxu3 }
 0x24a   : > { %v812_v53 = vadd.f32 %v782_v24, %v728_v52 }
 0x24b   : > { %v726_v25 = vpop.f32.mrf.mxu2 }
 0x24d   : > { %v700_v27 = vpop.f32.mrf.mxu0  ;;  %v713_v28 = vpop.f32.mrf.mxu1 }
 0x251   : > { %v784_v29 = vpop.f32.mrf.mxu3 }
 0x253   : > { %v866_v30 = vpop.f32.mrf.mxu2 }
 0x254   : > { %v896_v57 = vadd.f32 %v866_v30, %v812_v53 }
 0x255   : > { %v795_v31 = vpop.f32.mrf.mxu0  ;;  %v808_v32 = vpop.f32.mrf.mxu1 }
 0x256   : > { %v814_v40 = vadd.f32 %v808_v32, %v730_v49  ;;  %v813_v54 = vadd.f32 %v795_v31, %v729_v36 }
 0x259   : > { %v879_v34 = vpop.f32.mrf.mxu3 }
 0x25a   : > { %v897_v58 = vadd.f32 %v879_v34, %v813_v54 }
 0x25b   : > { %v868_v33 = vpop.f32.mrf.mxu2 }
 0x25d   : > { %v797_v35 = vpop.f32.mrf.mxu0  ;;  %v810_v37 = vpop.f32.mrf.mxu1 }
 0x261   : > { %v881_v38 = vpop.f32.mrf.mxu3 }
 0x263   : > { %v963_v39 = vpop.f32.mrf.mxu2 }
 0x264   : > { %v981_v61 = vadd.f32 %v963_v39, %v897_v58 }
 0x265   : > { %v892_v41 = vpop.f32.mrf.mxu0  ;;  %v950_v42 = vpop.f32.mrf.mxu1 }
 0x266   : > { %v898_v55 = vadd.f32 %v892_v41, %v814_v40  ;;  %v980_v62 = vadd.f32 %v950_v42, %v896_v57 }
 0x269   : > { %v976_v44 = vpop.f32.mrf.mxu3 }
 0x26a   : > { %v982_v59 = vadd.f32 %v976_v44, %v898_v55 }
 0x26b   : > { %v965_v46 = vpop.f32.mrf.mxu2 }
 0x26d   : > { %v894_v50 = vpop.f32.mrf.mxu0  ;;  %v952_v51 = vpop.f32.mrf.mxu1 }
 0x271   : > { %v978_v56 = vpop.f32.mrf.mxu3 }
 0x273   : > { %v1060_v60 = vpop.f32.mrf.mxu2 }
 0x274   : > { %v1066_v0 = vadd.f32 %v1060_v60, %v982_v59 }
 0x275   : > { %v1034_v1 = vpop.f32.mrf.mxu0  ;;  %v1047_v2 = vpop.f32.mrf.mxu1 }
 0x276   : > { %v1069_v63 = vmul.f32 %v1066_v0, %v297_v26  ;;  %v1064_v3 = vadd.f32 %v1034_v1, %v980_v62  ;;  %v1065_v4 = vadd.f32 %v1047_v2, %v981_v61 }
 0x278   : > { %v1071_v5 = vpack.c.bf16 %v1069_v63, %v1069_v63  ;;  %v1067_v6 = vmul.f32 %v1064_v3, %v295_v14  ;;  %v1068_v7 = vmul.f32 %v1065_v4, %v296_v10  ;;  %v1103_v14 = vmul.f32 %v1069_v63, %v1069_v63 }
 0x279   : > { %v1095_v20 = vsel %vm1094_vm5, %v1069_v63, 0.0 }
 0x27a   : > { %v1075_v9 = vrot.slane %v1071_v5, 4  ;;  %v1076_v11 = vrot.slane %v1071_v5, 6  ;;  %v1070_v12 = vpack.c.bf16 %v1068_v7, %v1067_v6  ;;  %v1091_v26 = vsel %vm302_vm0, %v1067_v6, 0.0 }
 0x27b   : > { %v1092_v13 = vsel %vm302_vm0, %v1068_v7, 0.0  ;;  %v1062_v15 = vpop.f32.mrf.mxu2  ;;  %v1101_v16 = vmul.f32 %v1067_v6, %v1067_v6  ;;  %v1102_v17 = vmul.f32 %v1068_v7, %v1068_v7  ;;  %v1107_v29 = vsel %vm1094_vm5, %v1103_v14, 0.0 }
 0x27c   : > { %v1074_v18 = vrot.slane %v1070_v12, 2  ;;  %v1093_v8 = vadd.f32 %v1092_v13, %v1091_v26  ;;  %v1083_v23 = vsel %vm1080_vm3, %v1075_v9, %v1076_v11 }
 0x27d   : > { %v1036_v10 = vpop.f32.mrf.mxu0  ;;  %v1049_v19 = vpop.f32.mrf.mxu1  ;;  %v1104_v21 = vsel %vm302_vm0, %v1101_v16, 0.0  ;;  %v1105_v22 = vsel %vm302_vm0, %v1102_v17, 0.0 }
 0x27e   : > { %v1079_v24 = vsel %vm379_vm7, %v1070_v12, %v1074_v18  ;;  %v1096_v25 = vadd.f32 %v1095_v20, %v1093_v8  ;;  %v1106_v27 = vadd.f32 %v1105_v22, %v1104_v21 }
 0x27f   : > { %v1084_v28 = vsel %vm302_vm0, %v1079_v24, %v1083_v23 }
 0x280   : > { %1090 = vst.msk [vmem:[%s258_s17] sm:$0x3f] %vm1089_vm8, %v1084_v28  ;;  %1097 = vadd.xlane.f32.xlu1 %v1096_v25  ;;  %v1108_v30 = vadd.f32 %v1107_v29, %v1106_v27 }
 0x282   : > { %1109 = vadd.xlane.f32.xlu2 %v1108_v30 }
 0x2f3   : > { %v1098_v31 = vpop.xlane.xlu1 %1097 }
 0x2f4   : > { %1100 = vst.msk [vmem:[%s262_s20] sm:$0xf] %vm1099_vm9, %v1098_v31 }
 0x2f5   : > { %v1110_v32 = vpop.xlane.xlu2 %1109 }
 0x2f6   : > { %1112 = vst.msk [vmem:[%s262_s20] sm:$0xf] %vm1111_vm10, %v1110_v32 }
 0x2f7 PF: > { %s17_s21 = sadd.s32 1, %s1272_s21  }
 0x2f8   : > { %p14_p4 = scmp.ge.s32.totalorder %s17_s21, 4  }
 0x2fa   :  { %16 = sbr.rel (!%p14_p4) target bundleno = 1 (0x1), region = 99 }

</bundles_post_ra>
